<compile_context>
chip_gen: v6e
topology: v6e:2x2x1
jax: 0.10.0
libtpu: 0.0.40
codegen_flags: <defaults>
</compile_context>

<pallas_src>
import functools

import jax
import jax.numpy as jnp
from jax.experimental import pallas as pl
from jax.experimental.pallas import tpu as pltpu


# ------------------------------- helpers ----------------------------------- #
def _round_up(x, m):
    return ((x + m - 1) // m) * m


def _vmem_budget_bytes():
    """Generation-aware scoped-VMEM budget (v7x has 64 MiB physical)."""
    cap = 64 * 1024 * 1024
    try:
        info = pltpu.get_tpu_info()
        cap = int(getattr(info, "vmem_capacity_bytes", cap))
    except Exception:
        pass
    return max(16 * 1024 * 1024, min(cap // 2, 64 * 1024 * 1024))


# ----------------------------- Pallas kernel ------------------------------- #
def _conv3d_direct_kernel(x_ref, w_ref, b_ref, o_ref, *, kern, Hp, Wp, Qc):
    # x_ref: (1, C_in_p, QI)   bf16  one sample: channels x flattened padded vol
    # w_ref: (kern^3, C_out_p, C_in_p) bf16
    # b_ref: (C_out_p, 1)      f32
    # o_ref: (1, C_out_p, Qc)  f32   lane-dense output (Qc % 128 == 0)
    xv = x_ref[0]                                    # (C_in_p, QI) bf16
    c_out_p = o_ref.shape[1]
    acc = jnp.zeros((c_out_p, Qc), jnp.float32)

    tap = 0
    for kd in range(kern):                           # unrolled k^3 tap loop
        for kh in range(kern):
            for kw in range(kern):
                off = kd * (Hp * Wp) + kh * Wp + kw  # static flat shift
                xs = xv[:, off:off + Qc]             # (C_in_p, Qc) bf16
                acc = acc + jnp.dot(
                    w_ref[tap], xs, preferred_element_type=jnp.float32)
                tap += 1

    o_ref[0] = acc + b_ref[...]                      # f32 bias add, f32 store


# ------------------------------- conv layer -------------------------------- #
def conv3d_pallas(x, w, b, stride, padding):
    """Plain 3D convolution (PyTorch nn.Conv3d semantics, NCDHW / OIDHW)."""
    N, C_in, D, H, W = x.shape
    C_out, _, k, _, _ = w.shape
    Dp, Hp, Wp = D + 2 * padding, H + 2 * padding, W + 2 * padding
    Do = (Dp - k) // stride + 1
    Ho = (Hp - k) // stride + 1
    Wo = (Wp - k) // stride + 1

    C_in_p = _round_up(C_in, 8)
    C_out_p = _round_up(C_out, 8)
    Q = Dp * Hp * Wp
    Qc = _round_up(Q, 128)                           # lane-dense compute width
    max_off = (k - 1) * (Hp * Wp + Wp + 1)
    QI = _round_up(Qc + max_off, 128)                # input slab width

    # Input slab: pad channels -> C_in_p, zero-pad spatially (the conv's own
    # padding), flatten spatial, zero-pad the tail, cast to bf16 (halves the
    # dominant HBM read).
    xp = jnp.pad(
        x, ((0, 0), (0, C_in_p - C_in),
            (padding, padding), (padding, padding), (padding, padding)))
    xf = xp.reshape(N, C_in_p, Q)
    xf = jnp.pad(xf, ((0, 0), (0, 0), (0, QI - Q))).astype(jnp.bfloat16)

    # Weights: (C_out, C_in, kd, kh, kw) -> (k^3, C_out_p, C_in_p), bf16.
    wt = jnp.transpose(w, (2, 3, 4, 0, 1)).reshape(k * k * k, C_out, C_in)
    wt = jnp.pad(wt, ((0, 0), (0, C_out_p - C_out), (0, C_in_p - C_in)))
    wt = wt.astype(jnp.bfloat16)
    bias = jnp.pad(b, (0, C_out_p - C_out)).astype(jnp.float32)
    bias = bias.reshape(C_out_p, 1)

    kernel = functools.partial(
        _conv3d_direct_kernel, kern=k, Hp=Hp, Wp=Wp, Qc=Qc)

    flops = 2 * N * (k ** 3) * C_out_p * C_in_p * Qc
    bytes_accessed = (xf.size * 2 + wt.size * 2 + bias.size * 4
                      + N * C_out_p * Qc * 4)

    out = pl.pallas_call(
        kernel,
        out_shape=jax.ShapeDtypeStruct((N, C_out_p, Qc), jnp.float32),
        grid_spec=pltpu.PrefetchScalarGridSpec(
            num_scalar_prefetch=0,
            grid=(N,),
            in_specs=[
                pl.BlockSpec((1, C_in_p, QI), lambda n: (n, 0, 0)),
                pl.BlockSpec((k * k * k, C_out_p, C_in_p),
                             lambda n: (0, 0, 0)),
                pl.BlockSpec((C_out_p, 1), lambda n: (0, 0)),
            ],
            out_specs=pl.BlockSpec((1, C_out_p, Qc), lambda n: (n, 0, 0)),
        ),
        compiler_params=pltpu.CompilerParams(
            dimension_semantics=("parallel",),
            vmem_limit_bytes=_vmem_budget_bytes(),
        ),
        cost_estimate=pl.CostEstimate(
            flops=flops, transcendentals=0, bytes_accessed=bytes_accessed),
    )(xf, wt, bias)

    # Slice off padded channels / garbage flat positions, gather the strided
    # output grid (identity slice when stride == 1).
    out = out[:, :C_out, :Q].reshape(N, C_out, Dp, Hp, Wp)
    out = out[:, :, ::stride, ::stride, ::stride][:, :, :Do, :Ho, :Wo]
    return out


# ------------------------------ MEN module ---------------------------------- #
def init_conv3d_params(key, c_in, c_out, k):
    """Deterministic PyTorch-like init: U(-1/sqrt(fan_in), 1/sqrt(fan_in))."""
    fan_in = c_in * k ** 3
    bound = 1.0 / (fan_in ** 0.5)
    kw_, kb_ = jax.random.split(key)
    w = jax.random.uniform(kw_, (c_out, c_in, k, k, k), jnp.float32,
                           -bound, bound)
    b = jax.random.uniform(kb_, (c_out,), jnp.float32, -bound, bound)
    return w, b


def init_men_params(key, c_in, c_out, kern):
    k1, k2, k3 = jax.random.split(key, 3)
    return [
        init_conv3d_params(k1, c_in, c_out // 2, kern),
        init_conv3d_params(k2, c_out // 2, c_out // 2, kern),
        init_conv3d_params(k3, c_out // 2, c_in, kern),
    ]


def men_forward(x, params, stride, padding):
    # MEN.forward: sequentially apply the three plain Conv3d (act_norm=False).
    for (w, b) in params:
        x = conv3d_pallas(x, w, b, stride, padding)
    return x


# ------------------------------- references --------------------------------- #
def _conv3d_ref(x, w, b, stride, padding, operand_dtype=None):
    if operand_dtype is not None:
        x = x.astype(operand_dtype)
        w = w.astype(operand_dtype)
    out = jax.lax.conv_general_dilated(
        x, w,
        window_strides=(stride,) * 3,
        padding=[(padding, padding)] * 3,
        dimension_numbers=("NCDHW", "OIDHW", "NCDHW"),
        preferred_element_type=jnp.float32,
    )
    return out + b.reshape(1, -1, 1, 1, 1)


def _men_ref(x, params, stride, padding, operand_dtype=None):
    for (w, b) in params:
        x = _conv3d_ref(x, w, b, stride, padding, operand_dtype)
    return x


if __name__ == "__main__":
    # Small shapes consistent with MEN(C_in, C_out, stride, kern, padding).
    N, C_in, C_out = 2, 4, 8
    D, H, W = 4, 8, 8
    stride, kern, padding = 1, 3, 1

    key = jax.random.PRNGKey(0)
    kx, kp = jax.random.split(key)
    x = jax.random.normal(kx, (N, C_in, D, H, W), jnp.float32)
    params = init_men_params(kp, C_in, C_out, kern)

    fwd = jax.jit(functools.partial(men_forward, stride=stride,
                                    padding=padding))
    out = jax.block_until_ready(fwd(x, params))

    # Matched-precision reference (bf16 operands, f32 accumulation) -> tight.
    ref_bf16 = jax.block_until_ready(
        _men_ref(x, params, stride, padding, operand_dtype=jnp.bfloat16))
    assert out.shape == ref_bf16.shape, (out.shape, ref_bf16.shape)
    assert jnp.allclose(out, ref_bf16, atol=1e-3, rtol=1e-3), (
        "mismatch vs bf16 reference, max |diff| = %g"
        % float(jnp.max(jnp.abs(out - ref_bf16))))

    # Loose sanity check vs the full-f32 reference (bf16 rounding only).
    ref_f32 = jax.block_until_ready(_men_ref(x, params, stride, padding))
    assert jnp.allclose(out, ref_f32, atol=5e-2, rtol=5e-2), (
        "mismatch vs f32 reference, max |diff| = %g"
        % float(jnp.max(jnp.abs(out - ref_f32))))

    print("KERNEL_OK")
</pallas_src>

<mosaic_0001>
module attributes {stable_mosaic.version = 11 : i64} {
  func.func @_conv3d_direct_kernel(%arg0: i32, %arg1: memref<1x8x896xbf16, #tpu.memory_space<vmem>>, %arg2: memref<27x8x8xbf16, #tpu.memory_space<vmem>>, %arg3: memref<8x1xf32, #tpu.memory_space<vmem>>, %arg4: memref<1x8x640xf32, #tpu.memory_space<vmem>>) attributes {dimension_semantics = [#tpu.dimension_semantics<parallel>], iteration_bounds = array<i64: 2>, scalar_prefetch = 0 : i64, scratch_operands = 0 : i64, tpu.core_type = #tpu.core_type<tc>, window_params = [{transform_indices = @transform_0, window_bounds = array<i64: 1, 8, 896>}, {pipeline_mode = #tpu.pipeline_mode<synchronous>, transform_indices = @transform_1, window_bounds = array<i64: 27, 8, 8>}, {pipeline_mode = #tpu.pipeline_mode<synchronous>, transform_indices = @transform_2, window_bounds = array<i64: 8, 1>}, {transform_indices = @transform_3, window_bounds = array<i64: 1, 8, 640>}]} {
    %c0 = arith.constant 0 : index
    %c0_0 = arith.constant 0 : index
    %c0_1 = arith.constant 0 : index
    %0 = vector.load %arg1[%c0, %c0_0, %c0_1] : memref<1x8x896xbf16, #tpu.memory_space<vmem>>, vector<1x8x896xbf16>
    %1 = vector.shape_cast %0 : vector<1x8x896xbf16> to vector<8x896xbf16>
    %cst = arith.constant 0.000000e+00 : f32
    %2 = vector.broadcast %cst : f32 to vector<8x640xf32>
    %3 = vector.extract_strided_slice %1 {offsets = [0, 0], sizes = [8, 640], strides = [1, 1]} : vector<8x896xbf16> to vector<8x640xbf16>
    %c0_2 = arith.constant 0 : index
    %c0_3 = arith.constant 0 : index
    %c0_4 = arith.constant 0 : index
    %4 = vector.load %arg2[%c0_2, %c0_3, %c0_4] : memref<27x8x8xbf16, #tpu.memory_space<vmem>>, vector<1x8x8xbf16>
    %5 = vector.shape_cast %4 : vector<1x8x8xbf16> to vector<8x8xbf16>
    %cst_5 = arith.constant dense<0.000000e+00> : vector<8x640xf32>
    %6 = tpu.matmul %5, %3, %cst_5 {dimension_numbers = #tpu.dot_dimension_numbers<[1], [0], [0], [1], [0, 0, 1, 1], [], []>} : vector<8x8xbf16>, vector<8x640xbf16>, vector<8x640xf32> -> vector<8x640xf32>
    %7 = arith.addf %2, %6 : vector<8x640xf32>
    %8 = vector.extract_strided_slice %1 {offsets = [0, 1], sizes = [8, 640], strides = [1, 1]} : vector<8x896xbf16> to vector<8x640xbf16>
    %c1 = arith.constant 1 : index
    %c0_6 = arith.constant 0 : index
    %c0_7 = arith.constant 0 : index
    %9 = vector.load %arg2[%c1, %c0_6, %c0_7] : memref<27x8x8xbf16, #tpu.memory_space<vmem>>, vector<1x8x8xbf16>
    %10 = vector.shape_cast %9 : vector<1x8x8xbf16> to vector<8x8xbf16>
    %cst_8 = arith.constant dense<0.000000e+00> : vector<8x640xf32>
    %11 = tpu.matmul %10, %8, %cst_8 {dimension_numbers = #tpu.dot_dimension_numbers<[1], [0], [0], [1], [0, 0, 1, 1], [], []>} : vector<8x8xbf16>, vector<8x640xbf16>, vector<8x640xf32> -> vector<8x640xf32>
    %12 = arith.addf %7, %11 : vector<8x640xf32>
    %13 = vector.extract_strided_slice %1 {offsets = [0, 2], sizes = [8, 640], strides = [1, 1]} : vector<8x896xbf16> to vector<8x640xbf16>
    %c2 = arith.constant 2 : index
    %c0_9 = arith.constant 0 : index
    %c0_10 = arith.constant 0 : index
    %14 = vector.load %arg2[%c2, %c0_9, %c0_10] : memref<27x8x8xbf16, #tpu.memory_space<vmem>>, vector<1x8x8xbf16>
    %15 = vector.shape_cast %14 : vector<1x8x8xbf16> to vector<8x8xbf16>
    %cst_11 = arith.constant dense<0.000000e+00> : vector<8x640xf32>
    %16 = tpu.matmul %15, %13, %cst_11 {dimension_numbers = #tpu.dot_dimension_numbers<[1], [0], [0], [1], [0, 0, 1, 1], [], []>} : vector<8x8xbf16>, vector<8x640xbf16>, vector<8x640xf32> -> vector<8x640xf32>
    %17 = arith.addf %12, %16 : vector<8x640xf32>
    %18 = vector.extract_strided_slice %1 {offsets = [0, 10], sizes = [8, 640], strides = [1, 1]} : vector<8x896xbf16> to vector<8x640xbf16>
    %c3 = arith.constant 3 : index
    %c0_12 = arith.constant 0 : index
    %c0_13 = arith.constant 0 : index
    %19 = vector.load %arg2[%c3, %c0_12, %c0_13] : memref<27x8x8xbf16, #tpu.memory_space<vmem>>, vector<1x8x8xbf16>
    %20 = vector.shape_cast %19 : vector<1x8x8xbf16> to vector<8x8xbf16>
    %cst_14 = arith.constant dense<0.000000e+00> : vector<8x640xf32>
    %21 = tpu.matmul %20, %18, %cst_14 {dimension_numbers = #tpu.dot_dimension_numbers<[1], [0], [0], [1], [0, 0, 1, 1], [], []>} : vector<8x8xbf16>, vector<8x640xbf16>, vector<8x640xf32> -> vector<8x640xf32>
    %22 = arith.addf %17, %21 : vector<8x640xf32>
    %23 = vector.extract_strided_slice %1 {offsets = [0, 11], sizes = [8, 640], strides = [1, 1]} : vector<8x896xbf16> to vector<8x640xbf16>
    %c4 = arith.constant 4 : index
    %c0_15 = arith.constant 0 : index
    %c0_16 = arith.constant 0 : index
    %24 = vector.load %arg2[%c4, %c0_15, %c0_16] : memref<27x8x8xbf16, #tpu.memory_space<vmem>>, vector<1x8x8xbf16>
    %25 = vector.shape_cast %24 : vector<1x8x8xbf16> to vector<8x8xbf16>
    %cst_17 = arith.constant dense<0.000000e+00> : vector<8x640xf32>
    %26 = tpu.matmul %25, %23, %cst_17 {dimension_numbers = #tpu.dot_dimension_numbers<[1], [0], [0], [1], [0, 0, 1, 1], [], []>} : vector<8x8xbf16>, vector<8x640xbf16>, vector<8x640xf32> -> vector<8x640xf32>
    %27 = arith.addf %22, %26 : vector<8x640xf32>
    %28 = vector.extract_strided_slice %1 {offsets = [0, 12], sizes = [8, 640], strides = [1, 1]} : vector<8x896xbf16> to vector<8x640xbf16>
    %c5 = arith.constant 5 : index
    %c0_18 = arith.constant 0 : index
    %c0_19 = arith.constant 0 : index
    %29 = vector.load %arg2[%c5, %c0_18, %c0_19] : memref<27x8x8xbf16, #tpu.memory_space<vmem>>, vector<1x8x8xbf16>
    %30 = vector.shape_cast %29 : vector<1x8x8xbf16> to vector<8x8xbf16>
    %cst_20 = arith.constant dense<0.000000e+00> : vector<8x640xf32>
    %31 = tpu.matmul %30, %28, %cst_20 {dimension_numbers = #tpu.dot_dimension_numbers<[1], [0], [0], [1], [0, 0, 1, 1], [], []>} : vector<8x8xbf16>, vector<8x640xbf16>, vector<8x640xf32> -> vector<8x640xf32>
    %32 = arith.addf %27, %31 : vector<8x640xf32>
    %33 = vector.extract_strided_slice %1 {offsets = [0, 20], sizes = [8, 640], strides = [1, 1]} : vector<8x896xbf16> to vector<8x640xbf16>
    %c6 = arith.constant 6 : index
    %c0_21 = arith.constant 0 : index
    %c0_22 = arith.constant 0 : index
    %34 = vector.load %arg2[%c6, %c0_21, %c0_22] : memref<27x8x8xbf16, #tpu.memory_space<vmem>>, vector<1x8x8xbf16>
    %35 = vector.shape_cast %34 : vector<1x8x8xbf16> to vector<8x8xbf16>
    %cst_23 = arith.constant dense<0.000000e+00> : vector<8x640xf32>
    %36 = tpu.matmul %35, %33, %cst_23 {dimension_numbers = #tpu.dot_dimension_numbers<[1], [0], [0], [1], [0, 0, 1, 1], [], []>} : vector<8x8xbf16>, vector<8x640xbf16>, vector<8x640xf32> -> vector<8x640xf32>
    %37 = arith.addf %32, %36 : vector<8x640xf32>
    %38 = vector.extract_strided_slice %1 {offsets = [0, 21], sizes = [8, 640], strides = [1, 1]} : vector<8x896xbf16> to vector<8x640xbf16>
    %c7 = arith.constant 7 : index
    %c0_24 = arith.constant 0 : index
    %c0_25 = arith.constant 0 : index
    %39 = vector.load %arg2[%c7, %c0_24, %c0_25] : memref<27x8x8xbf16, #tpu.memory_space<vmem>>, vector<1x8x8xbf16>
    %40 = vector.shape_cast %39 : vector<1x8x8xbf16> to vector<8x8xbf16>
    %cst_26 = arith.constant dense<0.000000e+00> : vector<8x640xf32>
    %41 = tpu.matmul %40, %38, %cst_26 {dimension_numbers = #tpu.dot_dimension_numbers<[1], [0], [0], [1], [0, 0, 1, 1], [], []>} : vector<8x8xbf16>, vector<8x640xbf16>, vector<8x640xf32> -> vector<8x640xf32>
    %42 = arith.addf %37, %41 : vector<8x640xf32>
    %43 = vector.extract_strided_slice %1 {offsets = [0, 22], sizes = [8, 640], strides = [1, 1]} : vector<8x896xbf16> to vector<8x640xbf16>
    %c8 = arith.constant 8 : index
    %c0_27 = arith.constant 0 : index
    %c0_28 = arith.constant 0 : index
    %44 = vector.load %arg2[%c8, %c0_27, %c0_28] : memref<27x8x8xbf16, #tpu.memory_space<vmem>>, vector<1x8x8xbf16>
    %45 = vector.shape_cast %44 : vector<1x8x8xbf16> to vector<8x8xbf16>
    %cst_29 = arith.constant dense<0.000000e+00> : vector<8x640xf32>
    %46 = tpu.matmul %45, %43, %cst_29 {dimension_numbers = #tpu.dot_dimension_numbers<[1], [0], [0], [1], [0, 0, 1, 1], [], []>} : vector<8x8xbf16>, vector<8x640xbf16>, vector<8x640xf32> -> vector<8x640xf32>
    %47 = arith.addf %42, %46 : vector<8x640xf32>
    %48 = vector.extract_strided_slice %1 {offsets = [0, 100], sizes = [8, 640], strides = [1, 1]} : vector<8x896xbf16> to vector<8x640xbf16>
    %c9 = arith.constant 9 : index
    %c0_30 = arith.constant 0 : index
    %c0_31 = arith.constant 0 : index
    %49 = vector.load %arg2[%c9, %c0_30, %c0_31] : memref<27x8x8xbf16, #tpu.memory_space<vmem>>, vector<1x8x8xbf16>
    %50 = vector.shape_cast %49 : vector<1x8x8xbf16> to vector<8x8xbf16>
    %cst_32 = arith.constant dense<0.000000e+00> : vector<8x640xf32>
    %51 = tpu.matmul %50, %48, %cst_32 {dimension_numbers = #tpu.dot_dimension_numbers<[1], [0], [0], [1], [0, 0, 1, 1], [], []>} : vector<8x8xbf16>, vector<8x640xbf16>, vector<8x640xf32> -> vector<8x640xf32>
    %52 = arith.addf %47, %51 : vector<8x640xf32>
    %53 = vector.extract_strided_slice %1 {offsets = [0, 101], sizes = [8, 640], strides = [1, 1]} : vector<8x896xbf16> to vector<8x640xbf16>
    %c10 = arith.constant 10 : index
    %c0_33 = arith.constant 0 : index
    %c0_34 = arith.constant 0 : index
    %54 = vector.load %arg2[%c10, %c0_33, %c0_34] : memref<27x8x8xbf16, #tpu.memory_space<vmem>>, vector<1x8x8xbf16>
    %55 = vector.shape_cast %54 : vector<1x8x8xbf16> to vector<8x8xbf16>
    %cst_35 = arith.constant dense<0.000000e+00> : vector<8x640xf32>
    %56 = tpu.matmul %55, %53, %cst_35 {dimension_numbers = #tpu.dot_dimension_numbers<[1], [0], [0], [1], [0, 0, 1, 1], [], []>} : vector<8x8xbf16>, vector<8x640xbf16>, vector<8x640xf32> -> vector<8x640xf32>
    %57 = arith.addf %52, %56 : vector<8x640xf32>
    %58 = vector.extract_strided_slice %1 {offsets = [0, 102], sizes = [8, 640], strides = [1, 1]} : vector<8x896xbf16> to vector<8x640xbf16>
    %c11 = arith.constant 11 : index
    %c0_36 = arith.constant 0 : index
    %c0_37 = arith.constant 0 : index
    %59 = vector.load %arg2[%c11, %c0_36, %c0_37] : memref<27x8x8xbf16, #tpu.memory_space<vmem>>, vector<1x8x8xbf16>
    %60 = vector.shape_cast %59 : vector<1x8x8xbf16> to vector<8x8xbf16>
    %cst_38 = arith.constant dense<0.000000e+00> : vector<8x640xf32>
    %61 = tpu.matmul %60, %58, %cst_38 {dimension_numbers = #tpu.dot_dimension_numbers<[1], [0], [0], [1], [0, 0, 1, 1], [], []>} : vector<8x8xbf16>, vector<8x640xbf16>, vector<8x640xf32> -> vector<8x640xf32>
    %62 = arith.addf %57, %61 : vector<8x640xf32>
    %63 = vector.extract_strided_slice %1 {offsets = [0, 110], sizes = [8, 640], strides = [1, 1]} : vector<8x896xbf16> to vector<8x640xbf16>
    %c12 = arith.constant 12 : index
    %c0_39 = arith.constant 0 : index
    %c0_40 = arith.constant 0 : index
    %64 = vector.load %arg2[%c12, %c0_39, %c0_40] : memref<27x8x8xbf16, #tpu.memory_space<vmem>>, vector<1x8x8xbf16>
    %65 = vector.shape_cast %64 : vector<1x8x8xbf16> to vector<8x8xbf16>
    %cst_41 = arith.constant dense<0.000000e+00> : vector<8x640xf32>
    %66 = tpu.matmul %65, %63, %cst_41 {dimension_numbers = #tpu.dot_dimension_numbers<[1], [0], [0], [1], [0, 0, 1, 1], [], []>} : vector<8x8xbf16>, vector<8x640xbf16>, vector<8x640xf32> -> vector<8x640xf32>
    %67 = arith.addf %62, %66 : vector<8x640xf32>
    %68 = vector.extract_strided_slice %1 {offsets = [0, 111], sizes = [8, 640], strides = [1, 1]} : vector<8x896xbf16> to vector<8x640xbf16>
    %c13 = arith.constant 13 : index
    %c0_42 = arith.constant 0 : index
    %c0_43 = arith.constant 0 : index
    %69 = vector.load %arg2[%c13, %c0_42, %c0_43] : memref<27x8x8xbf16, #tpu.memory_space<vmem>>, vector<1x8x8xbf16>
    %70 = vector.shape_cast %69 : vector<1x8x8xbf16> to vector<8x8xbf16>
    %cst_44 = arith.constant dense<0.000000e+00> : vector<8x640xf32>
    %71 = tpu.matmul %70, %68, %cst_44 {dimension_numbers = #tpu.dot_dimension_numbers<[1], [0], [0], [1], [0, 0, 1, 1], [], []>} : vector<8x8xbf16>, vector<8x640xbf16>, vector<8x640xf32> -> vector<8x640xf32>
    %72 = arith.addf %67, %71 : vector<8x640xf32>
    %73 = vector.extract_strided_slice %1 {offsets = [0, 112], sizes = [8, 640], strides = [1, 1]} : vector<8x896xbf16> to vector<8x640xbf16>
    %c14 = arith.constant 14 : index
    %c0_45 = arith.constant 0 : index
    %c0_46 = arith.constant 0 : index
    %74 = vector.load %arg2[%c14, %c0_45, %c0_46] : memref<27x8x8xbf16, #tpu.memory_space<vmem>>, vector<1x8x8xbf16>
    %75 = vector.shape_cast %74 : vector<1x8x8xbf16> to vector<8x8xbf16>
    %cst_47 = arith.constant dense<0.000000e+00> : vector<8x640xf32>
    %76 = tpu.matmul %75, %73, %cst_47 {dimension_numbers = #tpu.dot_dimension_numbers<[1], [0], [0], [1], [0, 0, 1, 1], [], []>} : vector<8x8xbf16>, vector<8x640xbf16>, vector<8x640xf32> -> vector<8x640xf32>
    %77 = arith.addf %72, %76 : vector<8x640xf32>
    %78 = vector.extract_strided_slice %1 {offsets = [0, 120], sizes = [8, 640], strides = [1, 1]} : vector<8x896xbf16> to vector<8x640xbf16>
    %c15 = arith.constant 15 : index
    %c0_48 = arith.constant 0 : index
    %c0_49 = arith.constant 0 : index
    %79 = vector.load %arg2[%c15, %c0_48, %c0_49] : memref<27x8x8xbf16, #tpu.memory_space<vmem>>, vector<1x8x8xbf16>
    %80 = vector.shape_cast %79 : vector<1x8x8xbf16> to vector<8x8xbf16>
    %cst_50 = arith.constant dense<0.000000e+00> : vector<8x640xf32>
    %81 = tpu.matmul %80, %78, %cst_50 {dimension_numbers = #tpu.dot_dimension_numbers<[1], [0], [0], [1], [0, 0, 1, 1], [], []>} : vector<8x8xbf16>, vector<8x640xbf16>, vector<8x640xf32> -> vector<8x640xf32>
    %82 = arith.addf %77, %81 : vector<8x640xf32>
    %83 = vector.extract_strided_slice %1 {offsets = [0, 121], sizes = [8, 640], strides = [1, 1]} : vector<8x896xbf16> to vector<8x640xbf16>
    %c16 = arith.constant 16 : index
    %c0_51 = arith.constant 0 : index
    %c0_52 = arith.constant 0 : index
    %84 = vector.load %arg2[%c16, %c0_51, %c0_52] : memref<27x8x8xbf16, #tpu.memory_space<vmem>>, vector<1x8x8xbf16>
    %85 = vector.shape_cast %84 : vector<1x8x8xbf16> to vector<8x8xbf16>
    %cst_53 = arith.constant dense<0.000000e+00> : vector<8x640xf32>
    %86 = tpu.matmul %85, %83, %cst_53 {dimension_numbers = #tpu.dot_dimension_numbers<[1], [0], [0], [1], [0, 0, 1, 1], [], []>} : vector<8x8xbf16>, vector<8x640xbf16>, vector<8x640xf32> -> vector<8x640xf32>
    %87 = arith.addf %82, %86 : vector<8x640xf32>
    %88 = vector.extract_strided_slice %1 {offsets = [0, 122], sizes = [8, 640], strides = [1, 1]} : vector<8x896xbf16> to vector<8x640xbf16>
    %c17 = arith.constant 17 : index
    %c0_54 = arith.constant 0 : index
    %c0_55 = arith.constant 0 : index
    %89 = vector.load %arg2[%c17, %c0_54, %c0_55] : memref<27x8x8xbf16, #tpu.memory_space<vmem>>, vector<1x8x8xbf16>
    %90 = vector.shape_cast %89 : vector<1x8x8xbf16> to vector<8x8xbf16>
    %cst_56 = arith.constant dense<0.000000e+00> : vector<8x640xf32>
    %91 = tpu.matmul %90, %88, %cst_56 {dimension_numbers = #tpu.dot_dimension_numbers<[1], [0], [0], [1], [0, 0, 1, 1], [], []>} : vector<8x8xbf16>, vector<8x640xbf16>, vector<8x640xf32> -> vector<8x640xf32>
    %92 = arith.addf %87, %91 : vector<8x640xf32>
    %93 = vector.extract_strided_slice %1 {offsets = [0, 200], sizes = [8, 640], strides = [1, 1]} : vector<8x896xbf16> to vector<8x640xbf16>
    %c18 = arith.constant 18 : index
    %c0_57 = arith.constant 0 : index
    %c0_58 = arith.constant 0 : index
    %94 = vector.load %arg2[%c18, %c0_57, %c0_58] : memref<27x8x8xbf16, #tpu.memory_space<vmem>>, vector<1x8x8xbf16>
    %95 = vector.shape_cast %94 : vector<1x8x8xbf16> to vector<8x8xbf16>
    %cst_59 = arith.constant dense<0.000000e+00> : vector<8x640xf32>
    %96 = tpu.matmul %95, %93, %cst_59 {dimension_numbers = #tpu.dot_dimension_numbers<[1], [0], [0], [1], [0, 0, 1, 1], [], []>} : vector<8x8xbf16>, vector<8x640xbf16>, vector<8x640xf32> -> vector<8x640xf32>
    %97 = arith.addf %92, %96 : vector<8x640xf32>
    %98 = vector.extract_strided_slice %1 {offsets = [0, 201], sizes = [8, 640], strides = [1, 1]} : vector<8x896xbf16> to vector<8x640xbf16>
    %c19 = arith.constant 19 : index
    %c0_60 = arith.constant 0 : index
    %c0_61 = arith.constant 0 : index
    %99 = vector.load %arg2[%c19, %c0_60, %c0_61] : memref<27x8x8xbf16, #tpu.memory_space<vmem>>, vector<1x8x8xbf16>
    %100 = vector.shape_cast %99 : vector<1x8x8xbf16> to vector<8x8xbf16>
    %cst_62 = arith.constant dense<0.000000e+00> : vector<8x640xf32>
    %101 = tpu.matmul %100, %98, %cst_62 {dimension_numbers = #tpu.dot_dimension_numbers<[1], [0], [0], [1], [0, 0, 1, 1], [], []>} : vector<8x8xbf16>, vector<8x640xbf16>, vector<8x640xf32> -> vector<8x640xf32>
    %102 = arith.addf %97, %101 : vector<8x640xf32>
    %103 = vector.extract_strided_slice %1 {offsets = [0, 202], sizes = [8, 640], strides = [1, 1]} : vector<8x896xbf16> to vector<8x640xbf16>
    %c20 = arith.constant 20 : index
    %c0_63 = arith.constant 0 : index
    %c0_64 = arith.constant 0 : index
    %104 = vector.load %arg2[%c20, %c0_63, %c0_64] : memref<27x8x8xbf16, #tpu.memory_space<vmem>>, vector<1x8x8xbf16>
    %105 = vector.shape_cast %104 : vector<1x8x8xbf16> to vector<8x8xbf16>
    %cst_65 = arith.constant dense<0.000000e+00> : vector<8x640xf32>
    %106 = tpu.matmul %105, %103, %cst_65 {dimension_numbers = #tpu.dot_dimension_numbers<[1], [0], [0], [1], [0, 0, 1, 1], [], []>} : vector<8x8xbf16>, vector<8x640xbf16>, vector<8x640xf32> -> vector<8x640xf32>
    %107 = arith.addf %102, %106 : vector<8x640xf32>
    %108 = vector.extract_strided_slice %1 {offsets = [0, 210], sizes = [8, 640], strides = [1, 1]} : vector<8x896xbf16> to vector<8x640xbf16>
    %c21 = arith.constant 21 : index
    %c0_66 = arith.constant 0 : index
    %c0_67 = arith.constant 0 : index
    %109 = vector.load %arg2[%c21, %c0_66, %c0_67] : memref<27x8x8xbf16, #tpu.memory_space<vmem>>, vector<1x8x8xbf16>
    %110 = vector.shape_cast %109 : vector<1x8x8xbf16> to vector<8x8xbf16>
    %cst_68 = arith.constant dense<0.000000e+00> : vector<8x640xf32>
    %111 = tpu.matmul %110, %108, %cst_68 {dimension_numbers = #tpu.dot_dimension_numbers<[1], [0], [0], [1], [0, 0, 1, 1], [], []>} : vector<8x8xbf16>, vector<8x640xbf16>, vector<8x640xf32> -> vector<8x640xf32>
    %112 = arith.addf %107, %111 : vector<8x640xf32>
    %113 = vector.extract_strided_slice %1 {offsets = [0, 211], sizes = [8, 640], strides = [1, 1]} : vector<8x896xbf16> to vector<8x640xbf16>
    %c22 = arith.constant 22 : index
    %c0_69 = arith.constant 0 : index
    %c0_70 = arith.constant 0 : index
    %114 = vector.load %arg2[%c22, %c0_69, %c0_70] : memref<27x8x8xbf16, #tpu.memory_space<vmem>>, vector<1x8x8xbf16>
    %115 = vector.shape_cast %114 : vector<1x8x8xbf16> to vector<8x8xbf16>
    %cst_71 = arith.constant dense<0.000000e+00> : vector<8x640xf32>
    %116 = tpu.matmul %115, %113, %cst_71 {dimension_numbers = #tpu.dot_dimension_numbers<[1], [0], [0], [1], [0, 0, 1, 1], [], []>} : vector<8x8xbf16>, vector<8x640xbf16>, vector<8x640xf32> -> vector<8x640xf32>
    %117 = arith.addf %112, %116 : vector<8x640xf32>
    %118 = vector.extract_strided_slice %1 {offsets = [0, 212], sizes = [8, 640], strides = [1, 1]} : vector<8x896xbf16> to vector<8x640xbf16>
    %c23 = arith.constant 23 : index
    %c0_72 = arith.constant 0 : index
    %c0_73 = arith.constant 0 : index
    %119 = vector.load %arg2[%c23, %c0_72, %c0_73] : memref<27x8x8xbf16, #tpu.memory_space<vmem>>, vector<1x8x8xbf16>
    %120 = vector.shape_cast %119 : vector<1x8x8xbf16> to vector<8x8xbf16>
    %cst_74 = arith.constant dense<0.000000e+00> : vector<8x640xf32>
    %121 = tpu.matmul %120, %118, %cst_74 {dimension_numbers = #tpu.dot_dimension_numbers<[1], [0], [0], [1], [0, 0, 1, 1], [], []>} : vector<8x8xbf16>, vector<8x640xbf16>, vector<8x640xf32> -> vector<8x640xf32>
    %122 = arith.addf %117, %121 : vector<8x640xf32>
    %123 = vector.extract_strided_slice %1 {offsets = [0, 220], sizes = [8, 640], strides = [1, 1]} : vector<8x896xbf16> to vector<8x640xbf16>
    %c24 = arith.constant 24 : index
    %c0_75 = arith.constant 0 : index
    %c0_76 = arith.constant 0 : index
    %124 = vector.load %arg2[%c24, %c0_75, %c0_76] : memref<27x8x8xbf16, #tpu.memory_space<vmem>>, vector<1x8x8xbf16>
    %125 = vector.shape_cast %124 : vector<1x8x8xbf16> to vector<8x8xbf16>
    %cst_77 = arith.constant dense<0.000000e+00> : vector<8x640xf32>
    %126 = tpu.matmul %125, %123, %cst_77 {dimension_numbers = #tpu.dot_dimension_numbers<[1], [0], [0], [1], [0, 0, 1, 1], [], []>} : vector<8x8xbf16>, vector<8x640xbf16>, vector<8x640xf32> -> vector<8x640xf32>
    %127 = arith.addf %122, %126 : vector<8x640xf32>
    %128 = vector.extract_strided_slice %1 {offsets = [0, 221], sizes = [8, 640], strides = [1, 1]} : vector<8x896xbf16> to vector<8x640xbf16>
    %c25 = arith.constant 25 : index
    %c0_78 = arith.constant 0 : index
    %c0_79 = arith.constant 0 : index
    %129 = vector.load %arg2[%c25, %c0_78, %c0_79] : memref<27x8x8xbf16, #tpu.memory_space<vmem>>, vector<1x8x8xbf16>
    %130 = vector.shape_cast %129 : vector<1x8x8xbf16> to vector<8x8xbf16>
    %cst_80 = arith.constant dense<0.000000e+00> : vector<8x640xf32>
    %131 = tpu.matmul %130, %128, %cst_80 {dimension_numbers = #tpu.dot_dimension_numbers<[1], [0], [0], [1], [0, 0, 1, 1], [], []>} : vector<8x8xbf16>, vector<8x640xbf16>, vector<8x640xf32> -> vector<8x640xf32>
    %132 = arith.addf %127, %131 : vector<8x640xf32>
    %133 = vector.extract_strided_slice %1 {offsets = [0, 222], sizes = [8, 640], strides = [1, 1]} : vector<8x896xbf16> to vector<8x640xbf16>
    %c26 = arith.constant 26 : index
    %c0_81 = arith.constant 0 : index
    %c0_82 = arith.constant 0 : index
    %134 = vector.load %arg2[%c26, %c0_81, %c0_82] : memref<27x8x8xbf16, #tpu.memory_space<vmem>>, vector<1x8x8xbf16>
    %135 = vector.shape_cast %134 : vector<1x8x8xbf16> to vector<8x8xbf16>
    %cst_83 = arith.constant dense<0.000000e+00> : vector<8x640xf32>
    %136 = tpu.matmul %135, %133, %cst_83 {dimension_numbers = #tpu.dot_dimension_numbers<[1], [0], [0], [1], [0, 0, 1, 1], [], []>} : vector<8x8xbf16>, vector<8x640xbf16>, vector<8x640xf32> -> vector<8x640xf32>
    %137 = arith.addf %132, %136 : vector<8x640xf32>
    %c0_84 = arith.constant 0 : index
    %c0_85 = arith.constant 0 : index
    %138 = vector.load %arg3[%c0_84, %c0_85] : memref<8x1xf32, #tpu.memory_space<vmem>>, vector<8x1xf32>
    %139 = vector.broadcast %138 : vector<8x1xf32> to vector<8x640xf32>
    %140 = arith.addf %137, %139 : vector<8x640xf32>
    %c0_86 = arith.constant 0 : index
    %c0_87 = arith.constant 0 : index
    %c0_88 = arith.constant 0 : index
    %141 = vector.load %arg4[%c0_86, %c0_87, %c0_88] : memref<1x8x640xf32, #tpu.memory_space<vmem>>, vector<1x8x640xf32>
    %142 = vector.shape_cast %141 : vector<1x8x640xf32> to vector<8x640xf32>
    %143 = vector.shape_cast %140 : vector<8x640xf32> to vector<1x8x640xf32>
    tpu.vector_store %arg4[%c0_86, %c0_87, %c0_88], %143 {strides = array<i32>} : memref<1x8x640xf32, #tpu.memory_space<vmem>>, vector<1x8x640xf32>,
    return
  }
  func.func @transform_0(%arg0: i32) -> (i32, i32, i32) {
    %c0_i32 = arith.constant 0 : i32
    %c0_i32_0 = arith.constant 0 : i32
    %c0_i32_1 = arith.constant 0 : i32
    return %arg0, %c0_i32, %c0_i32_0 : i32, i32, i32
  }
  func.func @transform_1(%arg0: i32) -> (i32, i32, i32) {
    %c0_i32 = arith.constant 0 : i32
    %c0_i32_0 = arith.constant 0 : i32
    %c0_i32_1 = arith.constant 0 : i32
    %c0_i32_2 = arith.constant 0 : i32
    return %c0_i32, %c0_i32_0, %c0_i32_1 : i32, i32, i32
  }
  func.func @transform_2(%arg0: i32) -> (i32, i32) {
    %c0_i32 = arith.constant 0 : i32
    %c0_i32_0 = arith.constant 0 : i32
    %c0_i32_1 = arith.constant 0 : i32
    return %c0_i32, %c0_i32_0 : i32, i32
  }
  func.func @transform_3(%arg0: i32) -> (i32, i32, i32) {
    %c0_i32 = arith.constant 0 : i32
    %c0_i32_0 = arith.constant 0 : i32
    %c0_i32_1 = arith.constant 0 : i32
    return %arg0, %c0_i32, %c0_i32_0 : i32, i32, i32
  }
}

</mosaic_0001>

<bundles_post_ra>
// kernel: men_forward.3
= control target key start
LH: loop header
LB: loop body
LE: loop exit
PB: predicated region body
PF: predicated region fallthrough
CT: control target
= control target key end

     0   :  { %s5190_s12 = smov 0   ;;  %s5991_s0 = inlined_call_operand.vmem [shape: bf16[2,8,896], index: 0, kind: input, shape index: {}]   ;;  %s5992_s1 = inlined_call_operand.vmem [shape: bf16[27,8,8], index: 1, kind: input, shape index: {}]   ;;  %s5993_s2 = inlined_call_operand.vmem [shape: f32[8,1], index: 2, kind: input, shape index: {}]   ;;  %s5994_s3 = inlined_call_operand.vmem [shape: f32[2,8,640], index: 3, kind: output, shape index: {}]  }
   0x1 LB: > { %s4693_s13 = sadd.s32 4294967295, %s5139_s12   ;;  %p4697_p0 = scmp.ge.s32.totalorder %s5139_s12, 1  ;;  %s5139_s12 = sphi %s5190_s12, %s13_s12  }
   0x2   : > { %p137_p1 = scmp.lt.s32.totalorder %s5139_s12, 3 }
   0x4   : > { %p138_p2 = pnand %p4697_p0, %p137_p1 }
   0x5   : > { %p161_p3 = scmp.lt.s32.totalorder (!%p138_p2), %s4693_s13, 1  ;;  %s5142_s18 = smov (!%p138_p2), 127  }
   0x6   : > { %141 = sbr.rel (%p138_p2) target bundleno = 661 (0x295), region = 32  ;;  %s5143_s19 = smov (!%p138_p2), 126  }
   0x7   : > { %s5144_s20 = smov (!%p138_p2), 118   ;;  %s5145_s21 = smov (!%p138_p2), 117  }
   0x8   : > { %s5146_s22 = smov (!%p138_p2), 116   ;;  %s5147_s23 = smov (!%p138_p2), 108  }
   0x9   : > { %s5148_s24 = smov (!%p138_p2), 107   ;;  %s5149_s25 = smov (!%p138_p2), 106  }
   0xa   : > { %s5150_s26 = smov (!%p138_p2), 28   ;;  %s5151_s27 = smov (!%p138_p2), 27  }
   0xb   : > { %s5996_s13 = smov (!%p161_p3, %s4693_s13), 1  ;;  %v5141_v0 = vmov 0   ;;  %vm206_vm0 = vcmask 1039360   ;;  %vm216_vm1 = vcmask 1043456   ;;  %s5152_s28 = smov 26   ;;  %vm212_vm2 = vcmask 64512  }
   0xc   : > { %s5086_s14 = smul.u32 28, %s5996_s13  ;;  %264 = vmatprep.mubr.bf16.mxu0 %v5141_v0  ;;  %305 = vmatprep.mubr.bf16.mxu1 %v5141_v0  ;;  %v4700_v17 = vld [vmem:[%s5992_s1 + $0x4] sm:$0xf]  ;;  %v5153_v21 = vmov 0.0   ;;  %vm5154_vm3 = vmmov 0   ;;  %vm508_vm4 = vcmask 1031168  }
   0xd   : > { %5125 = vset.pattern.permute.xlu0 %v5141_v0  ;;  %v176_v33 = vld [vmem:[%s5992_s1] sm:$0xf]  ;;  %s5155_s6 = smov 18   ;;  %vm673_vm5 = vcmask 965632   ;;  %v4717_v48 = vld [vmem:[%s5992_s1 + $0x8] sm:$0xf] }
   0xe   : > { %s5206_s17 = scalar_lea.vmem %s5991_s0, %s5086_s14  ;;  %s5156_s9 = smov 17   ;;  %vm838_vm6 = vcmask 957440   ;;  %v4723_v63 = vld [vmem:[%s5992_s1 + $0xc] sm:$0xf]  ;;  %vm1003_vm7 = vcmask 949248   ;;  %vm1168_vm8 = vcmask 883712  }
   0xf   : > { %v173_v1 = vld [vmem:[%s5206_s17 + $0x8] sm:$0xff]  ;;  %v172_v2 = vld [vmem:[%s5206_s17] sm:$0xff]  ;;  %v174_v7 = vld [vmem:[%s5206_s17 + $0x10] sm:$0xff]  ;;  %s5157_s14 = smov 16   ;;  %vm1333_vm9 = vcmask 875520   ;;  %vm1498_vm10 = vcmask 867328  }
  0x10   : > { %v5211_v3 = vcombine.low %v173_v1, %v173_v1  ;;  %v5213_v4 = vcombine.low %v172_v2, %v172_v2  ;;  %v5216_v5 = vcombine.high %v172_v2, %v172_v2  ;;  %v5219_v6 = vcombine.high %v173_v1, %v173_v1  ;;  %s5162_s29 = smov 55   ;;  %s5163_s5 = smov 54  }
  0x11   : > { %v5224_v8 = vcombine.low %v174_v7, %v174_v7  ;;  %v5226_v9 = vcombine.high %v174_v7, %v174_v7  ;;  %vm1663_vm11 = vcmask 228352   ;;  %vm1828_vm12 = vcmask 220160   ;;  %s5164_s8 = smov 46   ;;  %s5165_s11 = smov 45  }
  0x12   : > { %198 = vrot.lane.b32.xlu1 %v5211_v3, %s5142_s18  ;;  %194 = vrot.lane.b32.xlu0 %v5213_v4, %s5142_s18  ;;  %v358_v26 = vsel %vm216_vm1, %v5213_v4, 0  ;;  %v364_v29 = vsel %vm216_vm1, %v5211_v3, 0  ;;  %vm1993_vm13 = vcmask 211968   ;;  %vm2158_vm14 = vcmask 146432   ;;  %s5166_s16 = smov 44  }
  0x13   : > { %v370_v34 = vsel %vm216_vm1, %v5224_v8, 0  ;;  %vm2323_vm15 = vcmask 138240  }
  0x16   : > { %200 = vrot.lane.b32.xlu1 %v5219_v6, %s5142_s18  ;;  %196 = vrot.lane.b32.xlu0 %v5216_v5, %s5142_s18 }
  0x1a   : > { %204 = vrot.lane.b32.xlu1 %v5226_v9, %s5142_s18  ;;  %202 = vrot.lane.b32.xlu0 %v5224_v8, %s5142_s18  ;;  %s5158_s18 = smov 8  }
  0x1e   : > { %496 = vrot.lane.b32.xlu0 %v5213_v4, %s5143_s19  ;;  %498 = vrot.lane.b32.xlu1 %v5216_v5, %s5143_s19 }
  0x22   : > { %500 = vrot.lane.b32.xlu0 %v5211_v3, %s5143_s19  ;;  %502 = vrot.lane.b32.xlu1 %v5219_v6, %s5143_s19 }
  0x26   : > { %504 = vrot.lane.b32.xlu0 %v5224_v8, %s5143_s19  ;;  %506 = vrot.lane.b32.xlu1 %v5226_v9, %s5143_s19 }
  0x2a   : > { %661 = vrot.lane.b32.xlu0 %v5213_v4, %s5144_s20  ;;  %663 = vrot.lane.b32.xlu1 %v5216_v5, %s5144_s20 }
  0x2e   : > { %665 = vrot.lane.b32.xlu0 %v5211_v3, %s5144_s20  ;;  %667 = vrot.lane.b32.xlu1 %v5219_v6, %s5144_s20 }
  0x32   : > { %669 = vrot.lane.b32.xlu0 %v5224_v8, %s5144_s20  ;;  %671 = vrot.lane.b32.xlu1 %v5226_v9, %s5144_s20  ;;  %s5167_s20 = smov 36  }
  0x36   : > { %826 = vrot.lane.b32.xlu0 %v5213_v4, %s5145_s21  ;;  %828 = vrot.lane.b32.xlu1 %v5216_v5, %s5145_s21 }
  0x3a   : > { %830 = vrot.lane.b32.xlu0 %v5211_v3, %s5145_s21  ;;  %832 = vrot.lane.b32.xlu1 %v5219_v6, %s5145_s21 }
  0x3e   : > { %834 = vrot.lane.b32.xlu0 %v5224_v8, %s5145_s21  ;;  %836 = vrot.lane.b32.xlu1 %v5226_v9, %s5145_s21  ;;  %s5159_s21 = smov 7  }
  0x42   : > { %991 = vrot.lane.b32.xlu0 %v5213_v4, %s5146_s22  ;;  %993 = vrot.lane.b32.xlu1 %v5216_v5, %s5146_s22 }
  0x46   : > { %995 = vrot.lane.b32.xlu0 %v5211_v3, %s5146_s22  ;;  %997 = vrot.lane.b32.xlu1 %v5219_v6, %s5146_s22 }
  0x4a   : > { %999 = vrot.lane.b32.xlu0 %v5224_v8, %s5146_s22  ;;  %1001 = vrot.lane.b32.xlu1 %v5226_v9, %s5146_s22 }
  0x4e   : > { %1156 = vrot.lane.b32.xlu0 %v5213_v4, %s5147_s23  ;;  %1158 = vrot.lane.b32.xlu1 %v5216_v5, %s5147_s23 }
  0x52   : > { %1160 = vrot.lane.b32.xlu0 %v5211_v3, %s5147_s23  ;;  %1162 = vrot.lane.b32.xlu1 %v5219_v6, %s5147_s23 }
  0x56   : > { %1164 = vrot.lane.b32.xlu0 %v5224_v8, %s5147_s23  ;;  %1166 = vrot.lane.b32.xlu1 %v5226_v9, %s5147_s23  ;;  %s5168_s23 = smov 35  }
  0x5a   : > { %1321 = vrot.lane.b32.xlu0 %v5213_v4, %s5148_s24  ;;  %1323 = vrot.lane.b32.xlu1 %v5216_v5, %s5148_s24 }
  0x5e   : > { %1325 = vrot.lane.b32.xlu0 %v5211_v3, %s5148_s24  ;;  %1327 = vrot.lane.b32.xlu1 %v5219_v6, %s5148_s24 }
  0x62   : > { %1329 = vrot.lane.b32.xlu0 %v5224_v8, %s5148_s24  ;;  %1331 = vrot.lane.b32.xlu1 %v5226_v9, %s5148_s24  ;;  %s5160_s24 = smov 6  }
  0x66   : > { %1486 = vrot.lane.b32.xlu0 %v5213_v4, %s5149_s25  ;;  %1488 = vrot.lane.b32.xlu1 %v5216_v5, %s5149_s25 }
  0x6a   : > { %1490 = vrot.lane.b32.xlu0 %v5211_v3, %s5149_s25  ;;  %1492 = vrot.lane.b32.xlu1 %v5219_v6, %s5149_s25 }
  0x6e   : > { %1494 = vrot.lane.b32.xlu0 %v5224_v8, %s5149_s25  ;;  %1496 = vrot.lane.b32.xlu1 %v5226_v9, %s5149_s25 }
  0x72   : > { %1651 = vrot.lane.b32.xlu0 %v5213_v4, %s5150_s26  ;;  %1653 = vrot.lane.b32.xlu1 %v5216_v5, %s5150_s26 }
  0x76   : > { %1655 = vrot.lane.b32.xlu0 %v5211_v3, %s5150_s26  ;;  %1657 = vrot.lane.b32.xlu1 %v5219_v6, %s5150_s26 }
  0x7a   : > { %1659 = vrot.lane.b32.xlu0 %v5224_v8, %s5150_s26  ;;  %1661 = vrot.lane.b32.xlu1 %v5226_v9, %s5150_s26  ;;  %s5169_s26 = smov 34  }
  0x7e   : > { %1816 = vrot.lane.b32.xlu0 %v5213_v4, %s5151_s27  ;;  %1818 = vrot.lane.b32.xlu1 %v5216_v5, %s5151_s27 }
  0x82   : > { %1820 = vrot.lane.b32.xlu0 %v5211_v3, %s5151_s27  ;;  %1822 = vrot.lane.b32.xlu1 %v5219_v6, %s5151_s27 }
  0x84   : > { %v199_v10 = vpop.permute.xlu1 %198  ;;  %v195_v11 = vpop.permute.xlu0 %194 }
  0x86   : > { %1824 = vrot.lane.b32.xlu0 %v5224_v8, %s5151_s27  ;;  %1826 = vrot.lane.b32.xlu1 %v5226_v9, %s5151_s27  ;;  %s5161_s27 = smov 56  }
  0x88   : > { %v201_v12 = vpop.permute.xlu1 %200  ;;  %v197_v13 = vpop.permute.xlu0 %196 }
  0x89   : > { %v208_v14 = vsel %vm206_vm0, %v197_v13, %v199_v10  ;;  %v207_v15 = vsel %vm206_vm0, %v195_v11, %v197_v13  ;;  %v209_v18 = vsel %vm206_vm0, %v199_v10, %v201_v12 }
  0x8a   : > { %4707 = vmatprep.subr.msk.bf16.mxu0 %vm216_vm1, %v208_v14  ;;  %v218_v16 = vsel %vm216_vm1, %v207_v15, 0  ;;  %1981 = vrot.lane.b32.xlu0 %v5213_v4, %s5152_s28  ;;  %v224_v24 = vsel %vm216_vm1, %v209_v18, 0 }
  0x8b   : > { %247 = vmatpush1.bf16.msra.mxu0 %v218_v16  ;;  %1983 = vrot.lane.b32.xlu1 %v5216_v5, %s5152_s28 }
  0x8c   : > { %v205_v19 = vpop.permute.xlu1 %204  ;;  %v203_v20 = vpop.permute.xlu0 %202  ;;  %4924 = vmatprep.subr.bf16.mxu0 %v5153_v21 }
  0x8d   : > { %v211_v22 = vsel %vm206_vm0, %v203_v20, %v205_v19  ;;  %v210_v23 = vsel %vm206_vm0, %v201_v12, %v203_v20  ;;  %vm2488_vm0 = vcmask 130048  }
  0x8e   : > { %4708 = vmatmul.mubr.msk.bf16.vlgmr.msra.gmra.mxu0 %vm212_vm2, %v4700_v17  ;;  %4709 = vmatprep.subr.msk.bf16.mxu1 %vm216_vm1, %v210_v23  ;;  %v230_v25 = vsel %vm216_vm1, %v211_v22, 0  ;;  %v4729_v22 = vld [vmem:[%s5992_s1 + $0x10] sm:$0xf] }
  0x8f   : > { %288 = vmatpush1.bf16.msra.mxu1 %v224_v24  ;;  %4925 = vmatpush3.bf16.msra.mxu0 %v230_v25 }
  0x90   : > { %1985 = vrot.lane.b32.xlu0 %v5211_v3, %s5152_s28  ;;  %4926 = vmatprep.mubr.msk.bf16.mxu0 %vm5154_vm3, %v5153_v21  ;;  %v497_v27 = vpop.permute.xlu0 %496  ;;  %v499_v28 = vpop.permute.xlu1 %498 }
  0x91   : > { %4712 = vmatprep.subr.msk.bf16.mxu1 %vm216_vm1, %v5216_v5  ;;  %1987 = vrot.lane.b32.xlu1 %v5219_v6, %s5152_s28  ;;  %v509_v37 = vsel %vm508_vm4, %v497_v27, %v499_v28 }
  0x92   : > { %4710 = vmatmul.mubr.msk.bf16.vlgmr.msra.gmra.mxu1 %vm212_vm2, %v4700_v17  ;;  %4714 = vmatprep.subr.msk.bf16.mxu0 %vm216_vm1, %v5219_v6  ;;  %v518_v39 = vsel %vm216_vm1, %v509_v37, 0  ;;  %v4735_v37 = vld [vmem:[%s5992_s1 + $0x14] sm:$0xf] }
  0x93   : > { %387 = vmatpush1.bf16.msra.mxu1 %v358_v26  ;;  %404 = vmatprep.mubr.bf16.mxu1 %v5141_v0 }
  0x94   : > { %1989 = vrot.lane.b32.xlu0 %v5224_v8, %s5152_s28  ;;  %v501_v30 = vpop.permute.xlu0 %500  ;;  %v503_v31 = vpop.permute.xlu1 %502  ;;  %4930 = vmatprep.subr.bf16.mxu1 %v5153_v21 }
  0x95   : > { %1991 = vrot.lane.b32.xlu1 %v5226_v9, %s5152_s28  ;;  %v510_v32 = vsel %vm508_vm4, %v499_v28, %v501_v30  ;;  %v511_v42 = vsel %vm508_vm4, %v501_v30, %v503_v31 }
  0x96   : > { %4927 = vmatmul.mubr.msk.bf16.vlgmr.msra.gmra.mxu0 %vm212_vm2, %v4700_v17  ;;  %v524_v43 = vsel %vm216_vm1, %v511_v42, 0 }
  0x97   : > { %428 = vmatpush1.bf16.msra.mxu0 %v364_v29  ;;  %445 = vmatprep.mubr.bf16.mxu0 %v5141_v0 }
  0x98   : > { %2146 = vrot.lane.b32.xlu0 %v5213_v4, %s5155_s6  ;;  %4718 = vmatprep.subr.msk.bf16.mxu0 %vm216_vm1, %v510_v32  ;;  %v505_v35 = vpop.permute.xlu0 %504  ;;  %v507_v36 = vpop.permute.xlu1 %506 }
  0x99   : > { %2148 = vrot.lane.b32.xlu1 %v5216_v5, %s5155_s6  ;;  %v512_v38 = vsel %vm508_vm4, %v503_v31, %v505_v35  ;;  %v513_v46 = vsel %vm508_vm4, %v505_v35, %v507_v36  ;;  %vm2818_vm4 = vcmask 56320  }
  0x9a   : > { %4713 = vmatmul.mubr.msk.bf16.vlgmr.msra.gmra.mxu1 %vm212_vm2, %v176_v33  ;;  %v530_v49 = vsel %vm216_vm1, %v513_v46, 0 }
  0x9b   : > { %4931 = vmatpush3.bf16.msra.mxu1 %v370_v34  ;;  %4932 = vmatprep.mubr.msk.bf16.mxu1 %vm5154_vm3, %v5153_v21 }
  0x9c   : > { %2150 = vrot.lane.b32.xlu0 %v5211_v3, %s5155_s6  ;;  %4720 = vmatprep.subr.msk.bf16.mxu1 %vm216_vm1, %v512_v38  ;;  %v662_v40 = vpop.permute.xlu0 %661  ;;  %v664_v41 = vpop.permute.xlu1 %663 }
  0x9d   : > { %2152 = vrot.lane.b32.xlu1 %v5219_v6, %s5155_s6  ;;  %v674_v52 = vsel %vm673_vm5, %v662_v40, %v664_v41 }
  0x9e   : > { %4715 = vmatmul.mubr.msk.bf16.vlgmr.msra.gmra.mxu0 %vm212_vm2, %v176_v33  ;;  %v683_v54 = vsel %vm216_vm1, %v674_v52, 0  ;;  %v4741_v52 = vld [vmem:[%s5992_s1 + $0x18] sm:$0xf] }
  0x9f   : > { %547 = vmatpush1.bf16.msra.mxu0 %v518_v39  ;;  %564 = vmatprep.mubr.bf16.mxu0 %v5141_v0 }
  0xa0   : > { %2154 = vrot.lane.b32.xlu0 %v5224_v8, %s5155_s6  ;;  %4936 = vmatprep.subr.bf16.mxu0 %v5153_v21  ;;  %v666_v44 = vpop.permute.xlu0 %665  ;;  %v668_v45 = vpop.permute.xlu1 %667 }
  0xa1   : > { %2156 = vrot.lane.b32.xlu1 %v5226_v9, %s5155_s6  ;;  %v675_v47 = vsel %vm673_vm5, %v664_v41, %v666_v44  ;;  %v676_v57 = vsel %vm673_vm5, %v666_v44, %v668_v45 }
  0xa2   : > { %4933 = vmatmul.mubr.msk.bf16.vlgmr.msra.gmra.mxu1 %vm212_vm2, %v176_v33  ;;  %v689_v58 = vsel %vm216_vm1, %v676_v57, 0 }
  0xa3   : > { %588 = vmatpush1.bf16.msra.mxu1 %v524_v43  ;;  %605 = vmatprep.mubr.bf16.mxu1 %v5141_v0 }
  0xa4   : > { %2311 = vrot.lane.b32.xlu0 %v5213_v4, %s5156_s9  ;;  %4724 = vmatprep.subr.msk.bf16.mxu1 %vm216_vm1, %v675_v47  ;;  %v670_v50 = vpop.permute.xlu0 %669  ;;  %v672_v51 = vpop.permute.xlu1 %671 }
  0xa5   : > { %2313 = vrot.lane.b32.xlu1 %v5216_v5, %s5156_s9  ;;  %v677_v53 = vsel %vm673_vm5, %v668_v45, %v670_v50  ;;  %v678_v61 = vsel %vm673_vm5, %v670_v50, %v672_v51  ;;  %vm2983_vm5 = vcmask 48128  }
  0xa6   : > { %4719 = vmatmul.mubr.msk.bf16.vlgmr.msra.gmra.mxu0 %vm212_vm2, %v4717_v48  ;;  %v695_v1 = vsel %vm216_vm1, %v678_v61, 0 }
  0xa7   : > { %4937 = vmatpush3.bf16.msra.mxu0 %v530_v49  ;;  %4938 = vmatprep.mubr.msk.bf16.mxu0 %vm5154_vm3, %v5153_v21 }
  0xa8   : > { %2315 = vrot.lane.b32.xlu0 %v5211_v3, %s5156_s9  ;;  %4726 = vmatprep.subr.msk.bf16.mxu0 %vm216_vm1, %v677_v53  ;;  %v827_v55 = vpop.permute.xlu0 %826  ;;  %v829_v56 = vpop.permute.xlu1 %828 }
  0xa9   : > { %2317 = vrot.lane.b32.xlu1 %v5219_v6, %s5156_s9  ;;  %v839_v10 = vsel %vm838_vm6, %v827_v55, %v829_v56 }
  0xaa   : > { %4721 = vmatmul.mubr.msk.bf16.vlgmr.msra.gmra.mxu1 %vm212_vm2, %v4717_v48  ;;  %v848_v12 = vsel %vm216_vm1, %v839_v10, 0 }
  0xab   : > { %712 = vmatpush1.bf16.msra.mxu1 %v683_v54  ;;  %729 = vmatprep.mubr.bf16.mxu1 %v5141_v0 }
  0xac   : > { %2319 = vrot.lane.b32.xlu0 %v5224_v8, %s5156_s9  ;;  %4942 = vmatprep.subr.bf16.mxu1 %v5153_v21  ;;  %v831_v59 = vpop.permute.xlu0 %830  ;;  %v833_v60 = vpop.permute.xlu1 %832 }
  0xad   : > { %2321 = vrot.lane.b32.xlu1 %v5226_v9, %s5156_s9  ;;  %v840_v62 = vsel %vm838_vm6, %v829_v56, %v831_v59  ;;  %v841_v15 = vsel %vm838_vm6, %v831_v59, %v833_v60 }
  0xae   : > { %4939 = vmatmul.mubr.msk.bf16.vlgmr.msra.gmra.mxu0 %vm212_vm2, %v4717_v48  ;;  %v854_v16 = vsel %vm216_vm1, %v841_v15, 0 }
  0xaf   : > { %753 = vmatpush1.bf16.msra.mxu0 %v689_v58  ;;  %770 = vmatprep.mubr.bf16.mxu0 %v5141_v0 }
  0xb0   : > { %2476 = vrot.lane.b32.xlu0 %v5213_v4, %s5157_s14  ;;  %4730 = vmatprep.subr.msk.bf16.mxu0 %vm216_vm1, %v840_v62  ;;  %v835_v2 = vpop.permute.xlu0 %834  ;;  %v837_v7 = vpop.permute.xlu1 %836 }
  0xb1   : > { %2478 = vrot.lane.b32.xlu1 %v5216_v5, %s5157_s14  ;;  %v842_v11 = vsel %vm838_vm6, %v833_v60, %v835_v2  ;;  %v843_v19 = vsel %vm838_vm6, %v835_v2, %v837_v7  ;;  %v4747_v7 = vld [vmem:[%s5992_s1 + $0x1c] sm:$0xf]  ;;  %vm3151_vm6 = vcmask 457728  }
  0xb2   : > { %4725 = vmatmul.mubr.msk.bf16.vlgmr.msra.gmra.mxu1 %vm212_vm2, %v4723_v63  ;;  %v860_v23 = vsel %vm216_vm1, %v843_v19, 0  ;;  %v5508_v19 = vld [vmem:[%s5206_s17 + $0x18] ss:$0 sps:$4 sm:$0xff]  }
  0xb3   : > { %4943 = vmatpush3.bf16.msra.mxu1 %v695_v1  ;;  %4944 = vmatprep.mubr.msk.bf16.mxu1 %vm5154_vm3, %v5153_v21 }
  0xb4   : > { %2480 = vrot.lane.b32.xlu0 %v5211_v3, %s5157_s14  ;;  %4732 = vmatprep.subr.msk.bf16.mxu1 %vm216_vm1, %v842_v11  ;;  %v992_v13 = vpop.permute.xlu0 %991  ;;  %v994_v14 = vpop.permute.xlu1 %993 }
  0xb5   : > { %2482 = vrot.lane.b32.xlu1 %v5219_v6, %s5157_s14  ;;  %v1004_v26 = vsel %vm1003_vm7, %v992_v13, %v994_v14 }
  0xb6   : > { %4727 = vmatmul.mubr.msk.bf16.vlgmr.msra.gmra.mxu0 %vm212_vm2, %v4723_v63  ;;  %v1013_v28 = vsel %vm216_vm1, %v1004_v26, 0  ;;  %v4753_v26 = vld [vmem:[%s5992_s1 + $0x20] sm:$0xf] }
  0xb7   : > { %877 = vmatpush1.bf16.msra.mxu0 %v848_v12  ;;  %894 = vmatprep.mubr.bf16.mxu0 %v5141_v0 }
  0xb8   : > { %2484 = vrot.lane.b32.xlu0 %v5224_v8, %s5157_s14  ;;  %4948 = vmatprep.subr.bf16.mxu0 %v5153_v21  ;;  %v996_v17 = vpop.permute.xlu0 %995  ;;  %v998_v18 = vpop.permute.xlu1 %997 }
  0xb9   : > { %2486 = vrot.lane.b32.xlu1 %v5226_v9, %s5157_s14  ;;  %v1005_v20 = vsel %vm1003_vm7, %v994_v14, %v996_v17  ;;  %v1006_v31 = vsel %vm1003_vm7, %v996_v17, %v998_v18 }
  0xba   : > { %4945 = vmatmul.mubr.msk.bf16.vlgmr.msra.gmra.mxu1 %vm212_vm2, %v4723_v63  ;;  %v1019_v32 = vsel %vm216_vm1, %v1006_v31, 0 }
  0xbb   : > { %918 = vmatpush1.bf16.msra.mxu1 %v854_v16  ;;  %935 = vmatprep.mubr.bf16.mxu1 %v5141_v0 }
  0xbc   : > { %2641 = vrot.lane.b32.xlu0 %v5213_v4, %s5158_s18  ;;  %4736 = vmatprep.subr.msk.bf16.mxu1 %vm216_vm1, %v1005_v20  ;;  %v1000_v24 = vpop.permute.xlu0 %999  ;;  %v1002_v25 = vpop.permute.xlu1 %1001 }
  0xbd   : > { %2643 = vrot.lane.b32.xlu1 %v5216_v5, %s5158_s18  ;;  %v1007_v27 = vsel %vm1003_vm7, %v998_v18, %v1000_v24  ;;  %v1008_v35 = vsel %vm1003_vm7, %v1000_v24, %v1002_v25  ;;  %vm3316_vm7 = vcmask 449536  }
  0xbe   : > { %4731 = vmatmul.mubr.msk.bf16.vlgmr.msra.gmra.mxu0 %vm212_vm2, %v4729_v22  ;;  %v1025_v38 = vsel %vm216_vm1, %v1008_v35, 0 }
  0xbf   : > { %4949 = vmatpush3.bf16.msra.mxu0 %v860_v23  ;;  %4950 = vmatprep.mubr.msk.bf16.mxu0 %vm5154_vm3, %v5153_v21 }
  0xc0   : > { %2645 = vrot.lane.b32.xlu0 %v5211_v3, %s5158_s18  ;;  %4738 = vmatprep.subr.msk.bf16.mxu0 %vm216_vm1, %v1007_v27  ;;  %v1157_v29 = vpop.permute.xlu0 %1156  ;;  %v1159_v30 = vpop.permute.xlu1 %1158 }
  0xc1   : > { %2647 = vrot.lane.b32.xlu1 %v5219_v6, %s5158_s18  ;;  %v1169_v41 = vsel %vm1168_vm8, %v1157_v29, %v1159_v30 }
  0xc2   : > { %4733 = vmatmul.mubr.msk.bf16.vlgmr.msra.gmra.mxu1 %vm212_vm2, %v4729_v22  ;;  %v1178_v43 = vsel %vm216_vm1, %v1169_v41, 0  ;;  %v4759_v41 = vld [vmem:[%s5992_s1 + $0x24] sm:$0xf] }
  0xc3   : > { %1042 = vmatpush1.bf16.msra.mxu1 %v1013_v28  ;;  %1059 = vmatprep.mubr.bf16.mxu1 %v5141_v0 }
  0xc4   : > { %2649 = vrot.lane.b32.xlu0 %v5224_v8, %s5158_s18  ;;  %4954 = vmatprep.subr.bf16.mxu1 %v5153_v21  ;;  %v1161_v33 = vpop.permute.xlu0 %1160  ;;  %v1163_v34 = vpop.permute.xlu1 %1162 }
  0xc5   : > { %2651 = vrot.lane.b32.xlu1 %v5226_v9, %s5158_s18  ;;  %v1170_v36 = vsel %vm1168_vm8, %v1159_v30, %v1161_v33  ;;  %v1171_v46 = vsel %vm1168_vm8, %v1161_v33, %v1163_v34 }
  0xc6   : > { %4951 = vmatmul.mubr.msk.bf16.vlgmr.msra.gmra.mxu0 %vm212_vm2, %v4729_v22  ;;  %v1184_v47 = vsel %vm216_vm1, %v1171_v46, 0 }
  0xc7   : > { %1083 = vmatpush1.bf16.msra.mxu0 %v1019_v32  ;;  %1100 = vmatprep.mubr.bf16.mxu0 %v5141_v0 }
  0xc8   : > { %2806 = vrot.lane.b32.xlu0 %v5213_v4, %s5159_s21  ;;  %4742 = vmatprep.subr.msk.bf16.mxu0 %vm216_vm1, %v1170_v36  ;;  %v1165_v39 = vpop.permute.xlu0 %1164  ;;  %v1167_v40 = vpop.permute.xlu1 %1166 }
  0xc9   : > { %2808 = vrot.lane.b32.xlu1 %v5216_v5, %s5159_s21  ;;  %v1172_v42 = vsel %vm1168_vm8, %v1163_v34, %v1165_v39  ;;  %v1173_v50 = vsel %vm1168_vm8, %v1165_v39, %v1167_v40  ;;  %vm3481_vm8 = vcmask 441344  }
  0xca   : > { %4737 = vmatmul.mubr.msk.bf16.vlgmr.msra.gmra.mxu1 %vm212_vm2, %v4735_v37  ;;  %v1190_v53 = vsel %vm216_vm1, %v1173_v50, 0 }
  0xcb   : > { %4955 = vmatpush3.bf16.msra.mxu1 %v1025_v38  ;;  %4956 = vmatprep.mubr.msk.bf16.mxu1 %vm5154_vm3, %v5153_v21 }
  0xcc   : > { %2810 = vrot.lane.b32.xlu0 %v5211_v3, %s5159_s21  ;;  %4744 = vmatprep.subr.msk.bf16.mxu1 %vm216_vm1, %v1172_v42  ;;  %v1322_v44 = vpop.permute.xlu0 %1321  ;;  %v1324_v45 = vpop.permute.xlu1 %1323 }
  0xcd   : > { %2812 = vrot.lane.b32.xlu1 %v5219_v6, %s5159_s21  ;;  %v1334_v56 = vsel %vm1333_vm9, %v1322_v44, %v1324_v45 }
  0xce   : > { %4739 = vmatmul.mubr.msk.bf16.vlgmr.msra.gmra.mxu0 %vm212_vm2, %v4735_v37  ;;  %v1343_v58 = vsel %vm216_vm1, %v1334_v56, 0 }
  0xcf   : > { %1207 = vmatpush1.bf16.msra.mxu0 %v1178_v43  ;;  %1224 = vmatprep.mubr.bf16.mxu0 %v5141_v0 }
  0xd0   : > { %2814 = vrot.lane.b32.xlu0 %v5224_v8, %s5159_s21  ;;  %4960 = vmatprep.subr.bf16.mxu0 %v5153_v21  ;;  %v1326_v48 = vpop.permute.xlu0 %1325  ;;  %v1328_v49 = vpop.permute.xlu1 %1327 }
  0xd1   : > { %2816 = vrot.lane.b32.xlu1 %v5226_v9, %s5159_s21  ;;  %v1335_v51 = vsel %vm1333_vm9, %v1324_v45, %v1326_v48  ;;  %v1336_v60 = vsel %vm1333_vm9, %v1326_v48, %v1328_v49 }
  0xd2   : > { %4957 = vmatmul.mubr.msk.bf16.vlgmr.msra.gmra.mxu1 %vm212_vm2, %v4735_v37  ;;  %v1349_v61 = vsel %vm216_vm1, %v1336_v60, 0 }
  0xd3   : > { %1248 = vmatpush1.bf16.msra.mxu1 %v1184_v47  ;;  %1265 = vmatprep.mubr.bf16.mxu1 %v5141_v0 }
  0xd4   : > { %2971 = vrot.lane.b32.xlu0 %v5213_v4, %s5160_s24  ;;  %4748 = vmatprep.subr.msk.bf16.mxu1 %vm216_vm1, %v1335_v51  ;;  %v1330_v54 = vpop.permute.xlu0 %1329  ;;  %v1332_v55 = vpop.permute.xlu1 %1331 }
  0xd5   : > { %2973 = vrot.lane.b32.xlu1 %v5216_v5, %s5160_s24  ;;  %v1337_v57 = vsel %vm1333_vm9, %v1328_v49, %v1330_v54  ;;  %v1338_v1 = vsel %vm1333_vm9, %v1330_v54, %v1332_v55  ;;  %v4765_v54 = vld [vmem:[%s5992_s1 + $0x28] sm:$0xf]  ;;  %vm3646_vm9 = vcmask 375808  }
  0xd6   : > { %4743 = vmatmul.mubr.msk.bf16.vlgmr.msra.gmra.mxu0 %vm212_vm2, %v4741_v52  ;;  %v1355_v10 = vsel %vm216_vm1, %v1338_v1, 0 }
  0xd7   : > { %4961 = vmatpush3.bf16.msra.mxu0 %v1190_v53  ;;  %4962 = vmatprep.mubr.msk.bf16.mxu0 %vm5154_vm3, %v5153_v21 }
  0xd8   : > { %2975 = vrot.lane.b32.xlu0 %v5211_v3, %s5160_s24  ;;  %4750 = vmatprep.subr.msk.bf16.mxu0 %vm216_vm1, %v1337_v57  ;;  %v1487_v4 = vpop.permute.xlu0 %1486  ;;  %v1489_v59 = vpop.permute.xlu1 %1488 }
  0xd9   : > { %2977 = vrot.lane.b32.xlu1 %v5219_v6, %s5160_s24  ;;  %v1499_v13 = vsel %vm1498_vm10, %v1487_v4, %v1489_v59 }
  0xda   : > { %4745 = vmatmul.mubr.msk.bf16.vlgmr.msra.gmra.mxu1 %vm212_vm2, %v4741_v52  ;;  %v1508_v15 = vsel %vm216_vm1, %v1499_v13, 0 }
  0xdb   : > { %1372 = vmatpush1.bf16.msra.mxu1 %v1343_v58  ;;  %1389 = vmatprep.mubr.bf16.mxu1 %v5141_v0 }
  0xdc   : > { %2979 = vrot.lane.b32.xlu0 %v5224_v8, %s5160_s24  ;;  %4966 = vmatprep.subr.bf16.mxu1 %v5153_v21  ;;  %v1491_v62 = vpop.permute.xlu0 %1490  ;;  %v1493_v63 = vpop.permute.xlu1 %1492 }
  0xdd   : > { %2981 = vrot.lane.b32.xlu1 %v5226_v9, %s5160_s24  ;;  %v1500_v2 = vsel %vm1498_vm10, %v1489_v59, %v1491_v62  ;;  %v1501_v18 = vsel %vm1498_vm10, %v1491_v62, %v1493_v63 }
  0xde   : > { %4963 = vmatmul.mubr.msk.bf16.vlgmr.msra.gmra.mxu0 %vm212_vm2, %v4741_v52  ;;  %v1514_v20 = vsel %vm216_vm1, %v1501_v18, 0 }
  0xdf   : > { %1413 = vmatpush1.bf16.msra.mxu0 %v1349_v61  ;;  %1430 = vmatprep.mubr.bf16.mxu0 %v5141_v0 }
  0xe0   : > { %3139 = vrot.lane.b32.xlu0 %v5216_v5, %s5161_s27  ;;  %4754 = vmatprep.subr.msk.bf16.mxu0 %vm216_vm1, %v1500_v2  ;;  %v1495_v11 = vpop.permute.xlu0 %1494  ;;  %v1497_v12 = vpop.permute.xlu1 %1496 }
  0xe1   : > { %3141 = vrot.lane.b32.xlu1 %v5211_v3, %s5161_s27  ;;  %v1502_v14 = vsel %vm1498_vm10, %v1493_v63, %v1495_v11  ;;  %v1503_v24 = vsel %vm1498_vm10, %v1495_v11, %v1497_v12  ;;  %v4771_v11 = vld [vmem:[%s5992_s1 + $0x2c] sm:$0xf]  ;;  %vm3811_vm10 = vcmask 367616  }
  0xe2   : > { %4749 = vmatmul.mubr.msk.bf16.vlgmr.msra.gmra.mxu1 %vm212_vm2, %v4747_v7  ;;  %v1520_v27 = vsel %vm216_vm1, %v1503_v24, 0 }
  0xe3   : > { %4967 = vmatpush3.bf16.msra.mxu1 %v1355_v10  ;;  %4968 = vmatprep.mubr.msk.bf16.mxu1 %vm5154_vm3, %v5153_v21 }
  0xe4   : > { %3143 = vrot.lane.b32.xlu0 %v5219_v6, %s5161_s27  ;;  %4756 = vmatprep.subr.msk.bf16.mxu1 %vm216_vm1, %v1502_v14  ;;  %v1652_v16 = vpop.permute.xlu0 %1651  ;;  %v1654_v17 = vpop.permute.xlu1 %1653 }
  0xe5   : > { %3145 = vrot.lane.b32.xlu1 %v5224_v8, %s5161_s27  ;;  %v1664_v30 = vsel %vm1663_vm11, %v1652_v16, %v1654_v17 }
  0xe6   : > { %4751 = vmatmul.mubr.msk.bf16.vlgmr.msra.gmra.mxu0 %vm212_vm2, %v4747_v7  ;;  %v1673_v32 = vsel %vm216_vm1, %v1664_v30, 0 }
  0xe7   : > { %1537 = vmatpush1.bf16.msra.mxu0 %v1508_v15  ;;  %1554 = vmatprep.mubr.bf16.mxu0 %v5141_v0 }
  0xe8   : > { %3147 = vrot.lane.b32.xlu0 %v5226_v9, %s5161_s27  ;;  %4972 = vmatprep.subr.bf16.mxu0 %v5153_v21  ;;  %v1656_v22 = vpop.permute.xlu0 %1655  ;;  %v1658_v23 = vpop.permute.xlu1 %1657 }
  0xe9   : > { %3149 = vrot.lane.b32.xlu1 %v5508_v19, %s5161_s27  ;;  %v1665_v25 = vsel %vm1663_vm11, %v1654_v17, %v1656_v22  ;;  %v1666_v35 = vsel %vm1663_vm11, %v1656_v22, %v1658_v23 }
  0xea   : > { %4969 = vmatmul.mubr.msk.bf16.vlgmr.msra.gmra.mxu1 %vm212_vm2, %v4747_v7  ;;  %v1679_v36 = vsel %vm216_vm1, %v1666_v35, 0 }
  0xeb   : > { %1578 = vmatpush1.bf16.msra.mxu1 %v1514_v20  ;;  %1595 = vmatprep.mubr.bf16.mxu1 %v5141_v0 }
  0xec   : > { %3304 = vrot.lane.b32.xlu0 %v5216_v5, %s5162_s29  ;;  %4760 = vmatprep.subr.msk.bf16.mxu1 %vm216_vm1, %v1665_v25  ;;  %v1660_v28 = vpop.permute.xlu0 %1659  ;;  %v1662_v29 = vpop.permute.xlu1 %1661 }
  0xed   : > { %3306 = vrot.lane.b32.xlu1 %v5211_v3, %s5162_s29  ;;  %v1667_v31 = vsel %vm1663_vm11, %v1658_v23, %v1660_v28  ;;  %v1668_v39 = vsel %vm1663_vm11, %v1660_v28, %v1662_v29  ;;  %v4777_v28 = vld [vmem:[%s5992_s1 + $0x30] sm:$0xf]  ;;  %vm3976_vm11 = vcmask 359424  }
  0xee   : > { %4755 = vmatmul.mubr.msk.bf16.vlgmr.msra.gmra.mxu0 %vm212_vm2, %v4753_v26  ;;  %v1685_v42 = vsel %vm216_vm1, %v1668_v39, 0 }
  0xef   : > { %4973 = vmatpush3.bf16.msra.mxu0 %v1520_v27  ;;  %4974 = vmatprep.mubr.msk.bf16.mxu0 %vm5154_vm3, %v5153_v21 }
  0xf0   : > { %3308 = vrot.lane.b32.xlu0 %v5219_v6, %s5162_s29  ;;  %4762 = vmatprep.subr.msk.bf16.mxu0 %vm216_vm1, %v1667_v31  ;;  %v1817_v33 = vpop.permute.xlu0 %1816  ;;  %v1819_v34 = vpop.permute.xlu1 %1818 }
  0xf1   : > { %3310 = vrot.lane.b32.xlu1 %v5224_v8, %s5162_s29  ;;  %v1829_v45 = vsel %vm1828_vm12, %v1817_v33, %v1819_v34 }
  0xf2   : > { %4757 = vmatmul.mubr.msk.bf16.vlgmr.msra.gmra.mxu1 %vm212_vm2, %v4753_v26  ;;  %v1838_v47 = vsel %vm216_vm1, %v1829_v45, 0 }
  0xf3   : > { %1702 = vmatpush1.bf16.msra.mxu1 %v1673_v32  ;;  %1719 = vmatprep.mubr.bf16.mxu1 %v5141_v0 }
  0xf4   : > { %3312 = vrot.lane.b32.xlu0 %v5226_v9, %s5162_s29  ;;  %4978 = vmatprep.subr.bf16.mxu1 %v5153_v21  ;;  %v1821_v37 = vpop.permute.xlu0 %1820  ;;  %v1823_v38 = vpop.permute.xlu1 %1822 }
  0xf5   : > { %3314 = vrot.lane.b32.xlu1 %v5508_v19, %s5162_s29  ;;  %v1830_v40 = vsel %vm1828_vm12, %v1819_v34, %v1821_v37  ;;  %v1831_v49 = vsel %vm1828_vm12, %v1821_v37, %v1823_v38 }
  0xf6   : > { %4975 = vmatmul.mubr.msk.bf16.vlgmr.msra.gmra.mxu0 %vm212_vm2, %v4753_v26  ;;  %v1844_v51 = vsel %vm216_vm1, %v1831_v49, 0 }
  0xf7   : > { %1743 = vmatpush1.bf16.msra.mxu0 %v1679_v36  ;;  %1760 = vmatprep.mubr.bf16.mxu0 %v5141_v0 }
  0xf8   : > { %3469 = vrot.lane.b32.xlu0 %v5216_v5, %s5163_s5  ;;  %4766 = vmatprep.subr.msk.bf16.mxu0 %vm216_vm1, %v1830_v40  ;;  %v1825_v43 = vpop.permute.xlu0 %1824  ;;  %v1827_v44 = vpop.permute.xlu1 %1826 }
  0xf9   : > { %3471 = vrot.lane.b32.xlu1 %v5211_v3, %s5163_s5  ;;  %v1832_v46 = vsel %vm1828_vm12, %v1823_v38, %v1825_v43  ;;  %v1833_v52 = vsel %vm1828_vm12, %v1825_v43, %v1827_v44  ;;  %v4783_v43 = vld [vmem:[%s5992_s1 + $0x34] sm:$0xf]  ;;  %vm4141_vm12 = vcmask 293888  }
  0xfa   : > { %4761 = vmatmul.mubr.msk.bf16.vlgmr.msra.gmra.mxu1 %vm212_vm2, %v4759_v41  ;;  %v1850_v57 = vsel %vm216_vm1, %v1833_v52, 0 }
  0xfb   : > { %4979 = vmatpush3.bf16.msra.mxu1 %v1685_v42  ;;  %4980 = vmatprep.mubr.msk.bf16.mxu1 %vm5154_vm3, %v5153_v21 }
  0xfc   : > { %3473 = vrot.lane.b32.xlu0 %v5219_v6, %s5163_s5  ;;  %4768 = vmatprep.subr.msk.bf16.mxu1 %vm216_vm1, %v1832_v46  ;;  %v1982_v48 = vpop.permute.xlu0 %1981 }
  0xfd   : > { %3475 = vrot.lane.b32.xlu1 %v5224_v8, %s5163_s5  ;;  %v1984_v50 = vpop.permute.xlu1 %1983 }
  0xfe   : > { %4763 = vmatmul.mubr.msk.bf16.vlgmr.msra.gmra.mxu0 %vm212_vm2, %v4759_v41  ;;  %v1994_v58 = vsel %vm1993_vm13, %v1982_v48, %v1984_v50 }
  0xff   : > { %1867 = vmatpush1.bf16.msra.mxu0 %v1838_v47  ;;  %1884 = vmatprep.mubr.bf16.mxu0 %v5141_v0  ;;  %v2003_v61 = vsel %vm216_vm1, %v1994_v58, 0  ;;  %v4789_v58 = vld [vmem:[%s5992_s1 + $0x38] sm:$0xf] }
 0x100   : > { %3477 = vrot.lane.b32.xlu0 %v5226_v9, %s5163_s5  ;;  %4984 = vmatprep.subr.bf16.mxu0 %v5153_v21 }
 0x101   : > { %3479 = vrot.lane.b32.xlu1 %v5508_v19, %s5163_s5 }
 0x102   : > { %4981 = vmatmul.mubr.msk.bf16.vlgmr.msra.gmra.mxu1 %vm212_vm2, %v4759_v41  ;;  %v1986_v53 = vpop.permute.xlu0 %1985 }
 0x103   : > { %1908 = vmatpush1.bf16.msra.mxu1 %v1844_v51  ;;  %v1995_v55 = vsel %vm1993_vm13, %v1984_v50, %v1986_v53  ;;  %v1988_v56 = vpop.permute.xlu1 %1987  ;;  %1925 = vmatprep.mubr.bf16.mxu1 %v5141_v0 }
 0x104   : > { %3634 = vrot.lane.b32.xlu0 %v5216_v5, %s5164_s8  ;;  %4772 = vmatprep.subr.msk.bf16.mxu1 %vm216_vm1, %v1995_v55  ;;  %v1996_v62 = vsel %vm1993_vm13, %v1986_v53, %v1988_v56 }
 0x105   : > { %3636 = vrot.lane.b32.xlu1 %v5211_v3, %s5164_s8  ;;  %v2009_v2 = vsel %vm216_vm1, %v1996_v62, 0 }
 0x106   : > { %4767 = vmatmul.mubr.msk.bf16.vlgmr.msra.gmra.mxu0 %vm212_vm2, %v4765_v54  ;;  %v1990_v4 = vpop.permute.xlu0 %1989 }
 0x107   : > { %4985 = vmatpush3.bf16.msra.mxu0 %v1850_v57  ;;  %v1997_v59 = vsel %vm1993_vm13, %v1988_v56, %v1990_v4  ;;  %v1992_v60 = vpop.permute.xlu1 %1991  ;;  %4986 = vmatprep.mubr.msk.bf16.mxu0 %vm5154_vm3, %v5153_v21 }
 0x108   : > { %3638 = vrot.lane.b32.xlu0 %v5219_v6, %s5164_s8  ;;  %4774 = vmatprep.subr.msk.bf16.mxu0 %vm216_vm1, %v1997_v59  ;;  %v1998_v7 = vsel %vm1993_vm13, %v1990_v4, %v1992_v60  ;;  %vm4306_vm13 = vcmask 285696  }
 0x109   : > { %3640 = vrot.lane.b32.xlu1 %v5224_v8, %s5164_s8  ;;  %v2015_v14 = vsel %vm216_vm1, %v1998_v7, 0 }
 0x10a   : > { %4769 = vmatmul.mubr.msk.bf16.vlgmr.msra.gmra.mxu1 %vm212_vm2, %v4765_v54  ;;  %v2147_v63 = vpop.permute.xlu0 %2146 }
 0x10b   : > { %2032 = vmatpush1.bf16.msra.mxu1 %v2003_v61  ;;  %v2149_v1 = vpop.permute.xlu1 %2148  ;;  %2049 = vmatprep.mubr.bf16.mxu1 %v5141_v0 }
 0x10c   : > { %3642 = vrot.lane.b32.xlu0 %v5226_v9, %s5164_s8  ;;  %4990 = vmatprep.subr.bf16.mxu1 %v5153_v21  ;;  %v2159_v15 = vsel %vm2158_vm14, %v2147_v63, %v2149_v1 }
 0x10d   : > { %3644 = vrot.lane.b32.xlu1 %v5508_v19, %s5164_s8  ;;  %v2168_v20 = vsel %vm216_vm1, %v2159_v15, 0  ;;  %v4795_v15 = vld [vmem:[%s5992_s1 + $0x3c] sm:$0xf] }
 0x10e   : > { %4987 = vmatmul.mubr.msk.bf16.vlgmr.msra.gmra.mxu0 %vm212_vm2, %v4765_v54  ;;  %v2151_v10 = vpop.permute.xlu0 %2150 }
 0x10f   : > { %2073 = vmatpush1.bf16.msra.mxu0 %v2009_v2  ;;  %v2160_v12 = vsel %vm2158_vm14, %v2149_v1, %v2151_v10  ;;  %v2153_v13 = vpop.permute.xlu1 %2152  ;;  %2090 = vmatprep.mubr.bf16.mxu0 %v5141_v0 }
 0x110   : > { %3799 = vrot.lane.b32.xlu0 %v5216_v5, %s5165_s11  ;;  %4778 = vmatprep.subr.msk.bf16.mxu0 %vm216_vm1, %v2160_v12  ;;  %v2161_v22 = vsel %vm2158_vm14, %v2151_v10, %v2153_v13 }
 0x111   : > { %3801 = vrot.lane.b32.xlu1 %v5211_v3, %s5165_s11  ;;  %v2174_v25 = vsel %vm216_vm1, %v2161_v22, 0 }
 0x112   : > { %4773 = vmatmul.mubr.msk.bf16.vlgmr.msra.gmra.mxu1 %vm212_vm2, %v4771_v11  ;;  %v2155_v16 = vpop.permute.xlu0 %2154 }
 0x113   : > { %4991 = vmatpush3.bf16.msra.mxu1 %v2015_v14  ;;  %v2162_v17 = vsel %vm2158_vm14, %v2153_v13, %v2155_v16  ;;  %v2157_v18 = vpop.permute.xlu1 %2156  ;;  %4992 = vmatprep.mubr.msk.bf16.mxu1 %vm5154_vm3, %v5153_v21 }
 0x114   : > { %3803 = vrot.lane.b32.xlu0 %v5219_v6, %s5165_s11  ;;  %4780 = vmatprep.subr.msk.bf16.mxu1 %vm216_vm1, %v2162_v17  ;;  %v2163_v26 = vsel %vm2158_vm14, %v2155_v16, %v2157_v18  ;;  %vm4471_vm14 = vcmask 277504  }
 0x115   : > { %3805 = vrot.lane.b32.xlu1 %v5224_v8, %s5165_s11  ;;  %v2180_v31 = vsel %vm216_vm1, %v2163_v26, 0 }
 0x116   : > { %4775 = vmatmul.mubr.msk.bf16.vlgmr.msra.gmra.mxu0 %vm212_vm2, %v4771_v11  ;;  %v2312_v23 = vpop.permute.xlu0 %2311 }
 0x117   : > { %2197 = vmatpush1.bf16.msra.mxu0 %v2168_v20  ;;  %v2314_v24 = vpop.permute.xlu1 %2313  ;;  %2214 = vmatprep.mubr.bf16.mxu0 %v5141_v0 }
 0x118   : > { %3807 = vrot.lane.b32.xlu0 %v5226_v9, %s5165_s11  ;;  %4996 = vmatprep.subr.bf16.mxu0 %v5153_v21  ;;  %v2324_v32 = vsel %vm2323_vm15, %v2312_v23, %v2314_v24 }
 0x119   : > { %3809 = vrot.lane.b32.xlu1 %v5508_v19, %s5165_s11  ;;  %v2333_v36 = vsel %vm216_vm1, %v2324_v32, 0 }
 0x11a   : > { %4993 = vmatmul.mubr.msk.bf16.vlgmr.msra.gmra.mxu1 %vm212_vm2, %v4771_v11  ;;  %v2316_v27 = vpop.permute.xlu0 %2315 }
 0x11b   : > { %2238 = vmatpush1.bf16.msra.mxu1 %v2174_v25  ;;  %v2325_v29 = vsel %vm2323_vm15, %v2314_v24, %v2316_v27  ;;  %v2318_v30 = vpop.permute.xlu1 %2317  ;;  %2255 = vmatprep.mubr.bf16.mxu1 %v5141_v0 }
 0x11c   : > { %3964 = vrot.lane.b32.xlu0 %v5216_v5, %s5166_s16  ;;  %4784 = vmatprep.subr.msk.bf16.mxu1 %vm216_vm1, %v2325_v29  ;;  %v2326_v37 = vsel %vm2323_vm15, %v2316_v27, %v2318_v30 }
 0x11d   : > { %3966 = vrot.lane.b32.xlu1 %v5211_v3, %s5166_s16  ;;  %v2339_v40 = vsel %vm216_vm1, %v2326_v37, 0 }
 0x11e   : > { %4779 = vmatmul.mubr.msk.bf16.vlgmr.msra.gmra.mxu0 %vm212_vm2, %v4777_v28  ;;  %v2320_v33 = vpop.permute.xlu0 %2319 }
 0x11f   : > { %4997 = vmatpush3.bf16.msra.mxu0 %v2180_v31  ;;  %v2327_v34 = vsel %vm2323_vm15, %v2318_v30, %v2320_v33  ;;  %v2322_v35 = vpop.permute.xlu1 %2321  ;;  %4998 = vmatprep.mubr.msk.bf16.mxu0 %vm5154_vm3, %v5153_v21 }
 0x120   : > { %3968 = vrot.lane.b32.xlu0 %v5219_v6, %s5166_s16  ;;  %4786 = vmatprep.subr.msk.bf16.mxu0 %vm216_vm1, %v2327_v34  ;;  %v2328_v41 = vsel %vm2323_vm15, %v2320_v33, %v2322_v35 }
 0x121   : > { %3970 = vrot.lane.b32.xlu1 %v5224_v8, %s5166_s16  ;;  %v2345_v46 = vsel %vm216_vm1, %v2328_v41, 0 }
 0x122   : > { %4781 = vmatmul.mubr.msk.bf16.vlgmr.msra.gmra.mxu1 %vm212_vm2, %v4777_v28  ;;  %v2477_v38 = vpop.permute.xlu0 %2476 }
 0x123   : > { %2362 = vmatpush1.bf16.msra.mxu1 %v2333_v36  ;;  %v2479_v39 = vpop.permute.xlu1 %2478  ;;  %2379 = vmatprep.mubr.bf16.mxu1 %v5141_v0 }
 0x124   : > { %3972 = vrot.lane.b32.xlu0 %v5226_v9, %s5166_s16  ;;  %5002 = vmatprep.subr.bf16.mxu1 %v5153_v21  ;;  %v2489_v47 = vsel %vm2488_vm0, %v2477_v38, %v2479_v39 }
 0x125   : > { %3974 = vrot.lane.b32.xlu1 %v5508_v19, %s5166_s16  ;;  %v2498_v51 = vsel %vm216_vm1, %v2489_v47, 0 }
 0x126   : > { %4999 = vmatmul.mubr.msk.bf16.vlgmr.msra.gmra.mxu0 %vm212_vm2, %v4777_v28  ;;  %v2481_v42 = vpop.permute.xlu0 %2480  ;;  %v4801_v28 = vld [vmem:[%s5992_s1 + $0x40] sm:$0xf] }
 0x127   : > { %2403 = vmatpush1.bf16.msra.mxu0 %v2339_v40  ;;  %v2490_v44 = vsel %vm2488_vm0, %v2479_v39, %v2481_v42  ;;  %v2483_v45 = vpop.permute.xlu1 %2482  ;;  %2420 = vmatprep.mubr.bf16.mxu0 %v5141_v0 }
 0x128   : > { %4129 = vrot.lane.b32.xlu0 %v5216_v5, %s5167_s20  ;;  %4790 = vmatprep.subr.msk.bf16.mxu0 %vm216_vm1, %v2490_v44  ;;  %v2491_v52 = vsel %vm2488_vm0, %v2481_v42, %v2483_v45 }
 0x129   : > { %4131 = vrot.lane.b32.xlu1 %v5211_v3, %s5167_s20  ;;  %v2504_v55 = vsel %vm216_vm1, %v2491_v52, 0 }
 0x12a   : > { %4785 = vmatmul.mubr.msk.bf16.vlgmr.msra.gmra.mxu1 %vm212_vm2, %v4783_v43  ;;  %v2485_v48 = vpop.permute.xlu0 %2484 }
 0x12b   : > { %5003 = vmatpush3.bf16.msra.mxu1 %v2345_v46  ;;  %v2492_v49 = vsel %vm2488_vm0, %v2483_v45, %v2485_v48  ;;  %v2487_v50 = vpop.permute.xlu1 %2486  ;;  %5004 = vmatprep.mubr.msk.bf16.mxu1 %vm5154_vm3, %v5153_v21 }
 0x12c   : > { %4133 = vrot.lane.b32.xlu0 %v5219_v6, %s5167_s20  ;;  %4792 = vmatprep.subr.msk.bf16.mxu1 %vm216_vm1, %v2492_v49  ;;  %v2493_v56 = vsel %vm2488_vm0, %v2485_v48, %v2487_v50  ;;  %v4807_v48 = vld [vmem:[%s5992_s1 + $0x44] sm:$0xf] }
 0x12d   : > { %4135 = vrot.lane.b32.xlu1 %v5224_v8, %s5167_s20  ;;  %v2510_v60 = vsel %vm216_vm1, %v2493_v56, 0 }
 0x12e   : > { %4787 = vmatmul.mubr.msk.bf16.vlgmr.msra.gmra.mxu0 %vm212_vm2, %v4783_v43  ;;  %v2642_v53 = vpop.permute.xlu0 %2641 }
 0x12f   : > { %2527 = vmatpush1.bf16.msra.mxu0 %v2498_v51  ;;  %v2644_v54 = vpop.permute.xlu1 %2643  ;;  %2544 = vmatprep.mubr.bf16.mxu0 %v5141_v0 }
 0x130   : > { %4137 = vrot.lane.b32.xlu0 %v5226_v9, %s5167_s20  ;;  %5008 = vmatprep.subr.bf16.mxu0 %v5153_v21  ;;  %v2654_v61 = vsel %vm212_vm2, %v2642_v53, %v2644_v54 }
 0x131   : > { %4139 = vrot.lane.b32.xlu1 %v5508_v19, %s5167_s20  ;;  %v2663_v2 = vsel %vm216_vm1, %v2654_v61, 0 }
 0x132   : > { %5005 = vmatmul.mubr.msk.bf16.vlgmr.msra.gmra.mxu1 %vm212_vm2, %v4783_v43  ;;  %v2646_v57 = vpop.permute.xlu0 %2645 }
 0x133   : > { %2568 = vmatpush1.bf16.msra.mxu1 %v2504_v55  ;;  %v2655_v4 = vsel %vm212_vm2, %v2644_v54, %v2646_v57  ;;  %v2648_v59 = vpop.permute.xlu1 %2647  ;;  %2585 = vmatprep.mubr.bf16.mxu1 %v5141_v0 }
 0x134   : > { %4294 = vrot.lane.b32.xlu0 %v5216_v5, %s5168_s23  ;;  %4796 = vmatprep.subr.msk.bf16.mxu1 %vm216_vm1, %v2655_v4  ;;  %v2656_v7 = vsel %vm212_vm2, %v2646_v57, %v2648_v59 }
 0x135   : > { %4296 = vrot.lane.b32.xlu1 %v5211_v3, %s5168_s23  ;;  %v2669_v12 = vsel %vm216_vm1, %v2656_v7, 0 }
 0x136   : > { %4791 = vmatmul.mubr.msk.bf16.vlgmr.msra.gmra.mxu0 %vm212_vm2, %v4789_v58  ;;  %v2650_v62 = vpop.permute.xlu0 %2649 }
 0x137   : > { %5009 = vmatpush3.bf16.msra.mxu0 %v2510_v60  ;;  %v2657_v63 = vsel %vm212_vm2, %v2648_v59, %v2650_v62  ;;  %v2652_v1 = vpop.permute.xlu1 %2651  ;;  %5010 = vmatprep.mubr.msk.bf16.mxu0 %vm5154_vm3, %v5153_v21 }
 0x138   : > { %4298 = vrot.lane.b32.xlu0 %v5219_v6, %s5168_s23  ;;  %4798 = vmatprep.subr.msk.bf16.mxu0 %vm216_vm1, %v2657_v63  ;;  %v2658_v13 = vsel %vm212_vm2, %v2650_v62, %v2652_v1 }
 0x139   : > { %4300 = vrot.lane.b32.xlu1 %v5224_v8, %s5168_s23  ;;  %v2675_v18 = vsel %vm216_vm1, %v2658_v13, 0 }
 0x13a   : > { %4793 = vmatmul.mubr.msk.bf16.vlgmr.msra.gmra.mxu1 %vm212_vm2, %v4789_v58  ;;  %v2807_v10 = vpop.permute.xlu0 %2806 }
 0x13b   : > { %2692 = vmatpush1.bf16.msra.mxu1 %v2663_v2  ;;  %v2809_v11 = vpop.permute.xlu1 %2808  ;;  %2709 = vmatprep.mubr.bf16.mxu1 %v5141_v0 }
 0x13c   : > { %4302 = vrot.lane.b32.xlu0 %v5226_v9, %s5168_s23  ;;  %5014 = vmatprep.subr.bf16.mxu1 %v5153_v21  ;;  %v2819_v20 = vsel %vm2818_vm4, %v2807_v10, %v2809_v11 }
 0x13d   : > { %4304 = vrot.lane.b32.xlu1 %v5508_v19, %s5168_s23  ;;  %v2828_v25 = vsel %vm216_vm1, %v2819_v20, 0 }
 0x13e   : > { %5011 = vmatmul.mubr.msk.bf16.vlgmr.msra.gmra.mxu0 %vm212_vm2, %v4789_v58  ;;  %v2811_v14 = vpop.permute.xlu0 %2810 }
 0x13f   : > { %2733 = vmatpush1.bf16.msra.mxu0 %v2669_v12  ;;  %v2820_v16 = vsel %vm2818_vm4, %v2809_v11, %v2811_v14  ;;  %v2813_v17 = vpop.permute.xlu1 %2812  ;;  %2750 = vmatprep.mubr.bf16.mxu0 %v5141_v0 }
 0x140   : > { %4459 = vrot.lane.b32.xlu0 %v5216_v5, %s5169_s26  ;;  %4802 = vmatprep.subr.msk.bf16.mxu0 %vm216_vm1, %v2820_v16  ;;  %v2821_v5 = vsel %vm2818_vm4, %v2811_v14, %v2813_v17 }
 0x141   : > { %4461 = vrot.lane.b32.xlu1 %v5211_v3, %s5169_s26  ;;  %v2834_v27 = vsel %vm216_vm1, %v2821_v5, 0 }
 0x142   : > { %4797 = vmatmul.mubr.msk.bf16.vlgmr.msra.gmra.mxu1 %vm212_vm2, %v4795_v15  ;;  %v2815_v22 = vpop.permute.xlu0 %2814 }
 0x143   : > { %5015 = vmatpush3.bf16.msra.mxu1 %v2675_v18  ;;  %v2822_v23 = vsel %vm2818_vm4, %v2813_v17, %v2815_v22  ;;  %v2817_v24 = vpop.permute.xlu1 %2816  ;;  %5016 = vmatprep.mubr.msk.bf16.mxu1 %vm5154_vm3, %v5153_v21 }
 0x144   : > { %4463 = vrot.lane.b32.xlu0 %v5219_v6, %s5169_s26  ;;  %4804 = vmatprep.subr.msk.bf16.mxu1 %vm216_vm1, %v2822_v23  ;;  %v2823_v6 = vsel %vm2818_vm4, %v2815_v22, %v2817_v24  ;;  %v4813_v24 = vld [vmem:[%s5992_s1 + $0x48] sm:$0xf] }
 0x145   : > { %4465 = vrot.lane.b32.xlu1 %v5224_v8, %s5169_s26 }
 0x146   : > { %4799 = vmatmul.mubr.msk.bf16.vlgmr.msra.gmra.mxu0 %vm212_vm2, %v4795_v15  ;;  %v2972_v3 = vpop.permute.xlu0 %2971 }
 0x147   : > { %2857 = vmatpush1.bf16.msra.mxu0 %v2828_v25  ;;  %v2974_v26 = vpop.permute.xlu1 %2973  ;;  %2874 = vmatprep.mubr.bf16.mxu0 %v5141_v0 }
 0x148   : > { %4467 = vrot.lane.b32.xlu0 %v5226_v9, %s5169_s26  ;;  %5020 = vmatprep.subr.bf16.mxu0 %v5153_v21  ;;  %v2840_v9 = vsel %vm216_vm1, %v2823_v6, 0  ;;  %v2984_v31 = vsel %vm2983_vm5, %v2972_v3, %v2974_v26 }
 0x149   : > { %4469 = vrot.lane.b32.xlu1 %v5508_v19, %s5169_s26  ;;  %v2993_v35 = vsel %vm216_vm1, %v2984_v31, 0  ;;  %s5087_s26 = smul.u32 40, %s5996_s13 }
 0x14a   : > { %5017 = vmatmul.mubr.msk.bf16.vlgmr.msra.gmra.mxu1 %vm212_vm2, %v4795_v15  ;;  %v2976_v8 = vpop.permute.xlu0 %2975 }
 0x14b   : > { %2898 = vmatpush1.bf16.msra.mxu1 %v2834_v27  ;;  %v2985_v29 = vsel %vm2983_vm5, %v2974_v26, %v2976_v8  ;;  %v2978_v30 = vpop.permute.xlu1 %2977  ;;  %2915 = vmatprep.mubr.bf16.mxu1 %v5141_v0  ;;  %s170_s28 = scalar_lea.vmem %s5994_s3, %s5087_s26 }
 0x14c   : > { %4808 = vmatprep.subr.msk.bf16.mxu1 %vm216_vm1, %v2985_v29  ;;  %v2986_v37 = vsel %vm2983_vm5, %v2976_v8, %v2978_v30 }
 0x14d   : > { %v2999_v42 = vsel %vm216_vm1, %v2986_v37, 0 }
 0x14e   : > { %v266_v19 = vpop.f32.mrf.mxu0  ;;  %4803 = vmatmul.mubr.msk.bf16.vlgmr.msra.gmra.mxu0 %vm212_vm2, %v4801_v28  ;;  %v2980_v32 = vpop.permute.xlu0 %2979 }
 0x14f   : > { %5021 = vmatpush3.bf16.msra.mxu0 %v2840_v9  ;;  %v2987_v33 = vsel %vm2983_vm5, %v2978_v30, %v2980_v32  ;;  %v2982_v34 = vpop.permute.xlu1 %2981  ;;  %5022 = vmatprep.mubr.msk.bf16.mxu0 %vm5154_vm3, %v5153_v21 }
 0x150   : > { %v268_v36 = vpop.f32.mrf.mxu0  ;;  %4810 = vmatprep.subr.msk.bf16.mxu0 %vm216_vm1, %v2987_v33  ;;  %v2988_v45 = vsel %vm2983_vm5, %v2980_v32, %v2982_v34 }
 0x151   : > { %v3005_v51 = vsel %vm216_vm1, %v2988_v45, 0 }
 0x152   : > { %v270_v38 = vpop.f32.mrf.mxu0  ;;  %v307_v39 = vpop.f32.mrf.mxu1  ;;  %4805 = vmatmul.mubr.msk.bf16.vlgmr.msra.gmra.mxu1 %vm212_vm2, %v4801_v28 }
 0x153   : > { %3022 = vmatpush1.bf16.msra.mxu1 %v2993_v35  ;;  %v3140_v40 = vpop.permute.xlu0 %3139  ;;  %v3142_v41 = vpop.permute.xlu1 %3141  ;;  %3039 = vmatprep.mubr.bf16.mxu1 %v5141_v0 }
 0x154   : > { %v271_v43 = vpop.f32.mrf.mxu0  ;;  %v309_v44 = vpop.f32.mrf.mxu1  ;;  %5026 = vmatprep.subr.bf16.mxu1 %v5153_v21  ;;  %v3152_v55 = vsel %vm3151_vm6, %v3140_v40, %v3142_v41 }
 0x155   : > { %v3161_v60 = vsel %vm216_vm1, %v3152_v55, 0 }
 0x156   : > { %v311_v46 = vpop.f32.mrf.mxu1  ;;  %v348_v47 = vpop.f32.mrf.mxu0  ;;  %5023 = vmatmul.mubr.msk.bf16.vlgmr.msra.gmra.mxu0 %vm212_vm2, %v4801_v28 }
 0x157   : > { %3063 = vmatpush1.bf16.msra.mxu0 %v2999_v42  ;;  %v3144_v49 = vpop.permute.xlu0 %3143  ;;  %v3146_v50 = vpop.permute.xlu1 %3145  ;;  %3080 = vmatprep.mubr.bf16.mxu0 %v5141_v0 }
 0x158   : > { %v312_v52 = vpop.f32.mrf.mxu1  ;;  %v4928_v53 = vpop.f32.mrf.mxu0  ;;  %v3153_v54 = vsel %vm3151_vm6, %v3142_v41, %v3144_v49  ;;  %v3154_v1 = vsel %vm3151_vm6, %v3144_v49, %v3146_v50 }
 0x159   : > { %4815 = vmatprep.subr.msk.bf16.mxu0 %vm216_vm1, %v3153_v54  ;;  %v3167_v14 = vsel %vm216_vm1, %v3154_v1, 0 }
 0x15a   : > { %v351_v56 = vpop.f32.mrf.mxu0  ;;  %v406_v57 = vpop.f32.mrf.mxu1  ;;  %4809 = vmatmul.mubr.msk.bf16.vlgmr.msra.gmra.mxu1 %vm212_vm2, %v4807_v48 }
 0x15b   : > { %v407_v58 = vadd.f32 %v406_v57, %v266_v19  ;;  %5027 = vmatpush3.bf16.msra.mxu1 %v3005_v51  ;;  %v3148_v4 = vpop.permute.xlu0 %3147  ;;  %v3150_v59 = vpop.permute.xlu1 %3149  ;;  %5028 = vmatprep.mubr.msk.bf16.mxu1 %vm5154_vm3, %v5153_v21 }
 0x15c   : > { %v4929_v61 = vpop.f32.mrf.mxu0  ;;  %v408_v62 = vpop.f32.mrf.mxu1  ;;  %v3155_v63 = vsel %vm3151_vm6, %v3146_v50, %v3148_v4  ;;  %v3156_v17 = vsel %vm3151_vm6, %v3148_v4, %v3150_v59  ;;  %v4820_v50 = vld [vmem:[%s5992_s1 + $0x4c] sm:$0xf] }
 0x15d   : > { %v409_v2 = vadd.f32 %v408_v62, %v268_v36  ;;  %4817 = vmatprep.subr.msk.bf16.mxu1 %vm216_vm1, %v3155_v63  ;;  %v3173_v3 = vsel %vm216_vm1, %v3156_v17, 0 }
 0x15e   : > { %v410_v7 = vpop.f32.mrf.mxu1  ;;  %v447_v10 = vpop.f32.mrf.mxu0  ;;  %4811 = vmatmul.mubr.msk.bf16.vlgmr.msra.gmra.mxu0 %vm212_vm2, %v4807_v48 }
 0x15f   : > { %v448_v11 = vadd.f32 %v447_v10, %v307_v39  ;;  %3190 = vmatpush1.bf16.msra.mxu0 %v3161_v60  ;;  %v3305_v12 = vpop.permute.xlu0 %3304  ;;  %v3307_v13 = vpop.permute.xlu1 %3306  ;;  %3207 = vmatprep.mubr.bf16.mxu0 %v5141_v0 }
 0x160   : > { %v411_v15 = vpop.f32.mrf.mxu1  ;;  %v449_v16 = vpop.f32.mrf.mxu0  ;;  %5032 = vmatprep.subr.bf16.mxu0 %v5153_v21  ;;  %v3317_v8 = vsel %vm3316_vm7, %v3305_v12, %v3307_v13 }
 0x161   : > { %v450_v18 = vadd.f32 %v449_v16, %v309_v44  ;;  %v3326_v19 = vsel %vm216_vm1, %v3317_v8, 0 }
 0x162   : > { %v451_v20 = vpop.f32.mrf.mxu0  ;;  %v488_v22 = vpop.f32.mrf.mxu1  ;;  %5029 = vmatmul.mubr.msk.bf16.vlgmr.msra.gmra.mxu1 %vm212_vm2, %v4807_v48 }
 0x163   : > { %v489_v23 = vadd.f32 %v488_v22, %v348_v47  ;;  %3231 = vmatpush1.bf16.msra.mxu1 %v3167_v14  ;;  %v3309_v25 = vpop.permute.xlu0 %3308  ;;  %v3311_v5 = vpop.permute.xlu1 %3310  ;;  %3248 = vmatprep.mubr.bf16.mxu1 %v5141_v0 }
 0x164   : > { %v452_v26 = vpop.f32.mrf.mxu0  ;;  %v4934_v27 = vpop.f32.mrf.mxu1  ;;  %v3318_v6 = vsel %vm3316_vm7, %v3307_v13, %v3309_v25  ;;  %v3319_v35 = vsel %vm3316_vm7, %v3309_v25, %v3311_v5 }
 0x165   : > { %4821 = vmatprep.subr.msk.bf16.mxu1 %vm216_vm1, %v3318_v6  ;;  %v3332_v42 = vsel %vm216_vm1, %v3319_v35, 0 }
 0x166   : > { %v491_v28 = vpop.f32.mrf.mxu1  ;;  %v566_v29 = vpop.f32.mrf.mxu0  ;;  %4816 = vmatmul.mubr.msk.bf16.vlgmr.msra.gmra.mxu0 %vm212_vm2, %v4813_v24 }
 0x167   : > { %v654_v30 = vadd.f32 %v566_v29, %v407_v58  ;;  %5033 = vmatpush3.bf16.msra.mxu0 %v3173_v3  ;;  %v3313_v9 = vpop.permute.xlu0 %3312  ;;  %v3315_v31 = vpop.permute.xlu1 %3314  ;;  %5034 = vmatprep.mubr.msk.bf16.mxu0 %vm5154_vm3, %v5153_v21 }
 0x168   : > { %v4935_v32 = vpop.f32.mrf.mxu1  ;;  %v568_v33 = vpop.f32.mrf.mxu0  ;;  %v3320_v34 = vsel %vm3316_vm7, %v3311_v5, %v3313_v9  ;;  %v3321_v45 = vsel %vm3316_vm7, %v3313_v9, %v3315_v31  ;;  %v4826_v5 = vld [vmem:[%s5992_s1 + $0x50] sm:$0xf] }
 0x169   : > { %v655_v36 = vadd.f32 %v568_v33, %v409_v2  ;;  %4823 = vmatprep.subr.msk.bf16.mxu0 %vm216_vm1, %v3320_v34  ;;  %v3338_v53 = vsel %vm216_vm1, %v3321_v45, 0 }
 0x16a   : > { %v570_v37 = vpop.f32.mrf.mxu0  ;;  %v607_v38 = vpop.f32.mrf.mxu1  ;;  %4818 = vmatmul.mubr.msk.bf16.vlgmr.msra.gmra.mxu1 %vm212_vm2, %v4813_v24 }
 0x16b   : > { %v656_v39 = vadd.f32 %v607_v38, %v448_v11  ;;  %3355 = vmatpush1.bf16.msra.mxu1 %v3326_v19  ;;  %v3470_v40 = vpop.permute.xlu0 %3469  ;;  %v3472_v41 = vpop.permute.xlu1 %3471  ;;  %3372 = vmatprep.mubr.bf16.mxu1 %v5141_v0 }
 0x16c   : > { %v571_v43 = vpop.f32.mrf.mxu0  ;;  %v609_v44 = vpop.f32.mrf.mxu1  ;;  %5038 = vmatprep.subr.bf16.mxu1 %v5153_v21  ;;  %v3482_v57 = vsel %vm3481_vm8, %v3470_v40, %v3472_v41 }
 0x16d   : > { %v657_v46 = vadd.f32 %v609_v44, %v450_v18  ;;  %v3491_v62 = vsel %vm216_vm1, %v3482_v57, 0 }
 0x16e   : > { %v611_v47 = vpop.f32.mrf.mxu1  ;;  %v648_v48 = vpop.f32.mrf.mxu0  ;;  %5035 = vmatmul.mubr.msk.bf16.vlgmr.msra.gmra.mxu0 %vm212_vm2, %v4813_v24 }
 0x16f   : > { %v658_v49 = vadd.f32 %v648_v48, %v489_v23  ;;  %3396 = vmatpush1.bf16.msra.mxu0 %v3332_v42  ;;  %v3474_v51 = vpop.permute.xlu0 %3473  ;;  %v3476_v52 = vpop.permute.xlu1 %3475  ;;  %3413 = vmatprep.mubr.bf16.mxu0 %v5141_v0 }
 0x170   : > { %v612_v54 = vpop.f32.mrf.mxu1  ;;  %v4940_v55 = vpop.f32.mrf.mxu0  ;;  %v3483_v56 = vsel %vm3481_vm8, %v3472_v41, %v3474_v51  ;;  %v3484_v7 = vsel %vm3481_vm8, %v3474_v51, %v3476_v52 }
 0x171   : > { %4827 = vmatprep.subr.msk.bf16.mxu0 %vm216_vm1, %v3483_v56  ;;  %v3497_v16 = vsel %vm216_vm1, %v3484_v7, 0 }
 0x172   : > { %v651_v58 = vpop.f32.mrf.mxu0  ;;  %v731_v4 = vpop.f32.mrf.mxu1  ;;  %4822 = vmatmul.mubr.msk.bf16.vlgmr.msra.gmra.mxu1 %vm212_vm2, %v4820_v50 }
 0x173   : > { %v819_v59 = vadd.f32 %v731_v4, %v654_v30  ;;  %5039 = vmatpush3.bf16.msra.mxu1 %v3338_v53  ;;  %v3478_v60 = vpop.permute.xlu0 %3477  ;;  %v3480_v61 = vpop.permute.xlu1 %3479  ;;  %5040 = vmatprep.mubr.msk.bf16.mxu1 %vm5154_vm3, %v5153_v21 }
 0x174   : > { %v4941_v63 = vpop.f32.mrf.mxu0  ;;  %v733_v1 = vpop.f32.mrf.mxu1  ;;  %v3485_v2 = vsel %vm3481_vm8, %v3476_v52, %v3478_v60  ;;  %v3486_v20 = vsel %vm3481_vm8, %v3478_v60, %v3480_v61  ;;  %v4832_v52 = vld [vmem:[%s5992_s1 + $0x54] sm:$0xf] }
 0x175   : > { %v820_v10 = vadd.f32 %v733_v1, %v655_v36  ;;  %4829 = vmatprep.subr.msk.bf16.mxu1 %vm216_vm1, %v3485_v2  ;;  %v3503_v27 = vsel %vm216_vm1, %v3486_v20, 0 }
 0x176   : > { %v735_v11 = vpop.f32.mrf.mxu1  ;;  %v772_v12 = vpop.f32.mrf.mxu0  ;;  %4824 = vmatmul.mubr.msk.bf16.vlgmr.msra.gmra.mxu0 %vm212_vm2, %v4820_v50 }
 0x177   : > { %v821_v13 = vadd.f32 %v772_v12, %v656_v39  ;;  %3520 = vmatpush1.bf16.msra.mxu0 %v3491_v62  ;;  %v3635_v14 = vpop.permute.xlu0 %3634  ;;  %v3637_v15 = vpop.permute.xlu1 %3636  ;;  %3537 = vmatprep.mubr.bf16.mxu0 %v5141_v0  ;;  %v4622_v11 = vld [vmem:[%s5993_s2] sm:$0xff] }
 0x178   : > { %v736_v17 = vpop.f32.mrf.mxu1  ;;  %v774_v18 = vpop.f32.mrf.mxu0  ;;  %5044 = vmatprep.subr.bf16.mxu0 %v5153_v21  ;;  %v3647_v29 = vsel %vm3646_vm9, %v3635_v14, %v3637_v15  ;;  %4625 = vperm.xlu0 %5125, %v4622_v11  }
 0x179   : > { %v822_v22 = vadd.f32 %v774_v18, %v657_v46  ;;  %v3656_v33 = vsel %vm216_vm1, %v3647_v29, 0 }
 0x17a   : > { %v776_v23 = vpop.f32.mrf.mxu0  ;;  %v813_v24 = vpop.f32.mrf.mxu1  ;;  %5041 = vmatmul.mubr.msk.bf16.vlgmr.msra.gmra.mxu1 %vm212_vm2, %v4820_v50 }
 0x17b   : > { %v823_v25 = vadd.f32 %v813_v24, %v658_v49  ;;  %3561 = vmatpush1.bf16.msra.mxu1 %v3497_v16  ;;  %v3639_v3 = vpop.permute.xlu0 %3638  ;;  %v3641_v26 = vpop.permute.xlu1 %3640  ;;  %3578 = vmatprep.mubr.bf16.mxu1 %v5141_v0 }
 0x17c   : > { %v777_v6 = vpop.f32.mrf.mxu0  ;;  %v4946_v8 = vpop.f32.mrf.mxu1  ;;  %v3648_v28 = vsel %vm3646_vm9, %v3637_v15, %v3639_v3  ;;  %v3649_v37 = vsel %vm3646_vm9, %v3639_v3, %v3641_v26 }
 0x17d   : > { %4833 = vmatprep.subr.msk.bf16.mxu1 %vm216_vm1, %v3648_v28  ;;  %v3662_v44 = vsel %vm216_vm1, %v3649_v37, 0 }
 0x17e   : > { %v816_v30 = vpop.f32.mrf.mxu1  ;;  %v896_v9 = vpop.f32.mrf.mxu0  ;;  %4828 = vmatmul.mubr.msk.bf16.vlgmr.msra.gmra.mxu0 %vm212_vm2, %v4826_v5 }
 0x17f   : > { %v984_v31 = vadd.f32 %v896_v9, %v819_v59  ;;  %5045 = vmatpush3.bf16.msra.mxu0 %v3503_v27  ;;  %v3643_v19 = vpop.permute.xlu0 %3642  ;;  %v3645_v32 = vpop.permute.xlu1 %3644  ;;  %5046 = vmatprep.mubr.msk.bf16.mxu0 %vm5154_vm3, %v5153_v21  ;;  %v4838_v27 = vld [vmem:[%s5992_s1 + $0x58] sm:$0xf] }
 0x180   : > { %v4947_v34 = vpop.f32.mrf.mxu1  ;;  %v898_v35 = vpop.f32.mrf.mxu0  ;;  %v3650_v36 = vsel %vm3646_vm9, %v3641_v26, %v3643_v19  ;;  %v3651_v47 = vsel %vm3646_vm9, %v3643_v19, %v3645_v32 }
 0x181   : > { %v985_v38 = vadd.f32 %v898_v35, %v820_v10  ;;  %4835 = vmatprep.subr.msk.bf16.mxu0 %vm216_vm1, %v3650_v36  ;;  %v3668_v55 = vsel %vm216_vm1, %v3651_v47, 0 }
 0x182   : > { %v900_v39 = vpop.f32.mrf.mxu0  ;;  %v937_v40 = vpop.f32.mrf.mxu1  ;;  %4830 = vmatmul.mubr.msk.bf16.vlgmr.msra.gmra.mxu1 %vm212_vm2, %v4826_v5 }
 0x183   : > { %v986_v41 = vadd.f32 %v937_v40, %v821_v13  ;;  %3685 = vmatpush1.bf16.msra.mxu1 %v3656_v33  ;;  %v3800_v42 = vpop.permute.xlu0 %3799  ;;  %v3802_v43 = vpop.permute.xlu1 %3801  ;;  %3702 = vmatprep.mubr.bf16.mxu1 %v5141_v0 }
 0x184   : > { %v901_v45 = vpop.f32.mrf.mxu0  ;;  %v939_v46 = vpop.f32.mrf.mxu1  ;;  %5050 = vmatprep.subr.bf16.mxu1 %v5153_v21  ;;  %v3812_v4 = vsel %vm3811_vm10, %v3800_v42, %v3802_v43 }
 0x185   : > { %v987_v48 = vadd.f32 %v939_v46, %v822_v22  ;;  %v3821_v1 = vsel %vm216_vm1, %v3812_v4, 0 }
 0x186   : > { %v941_v49 = vpop.f32.mrf.mxu1  ;;  %v978_v50 = vpop.f32.mrf.mxu0  ;;  %5047 = vmatmul.mubr.msk.bf16.vlgmr.msra.gmra.mxu0 %vm212_vm2, %v4826_v5 }
 0x187   : > { %v988_v51 = vadd.f32 %v978_v50, %v823_v25  ;;  %3726 = vmatpush1.bf16.msra.mxu0 %v3662_v44  ;;  %v3804_v53 = vpop.permute.xlu0 %3803  ;;  %v3806_v54 = vpop.permute.xlu1 %3805  ;;  %3743 = vmatprep.mubr.bf16.mxu0 %v5141_v0 }
 0x188   : > { %v942_v56 = vpop.f32.mrf.mxu1  ;;  %v4952_v57 = vpop.f32.mrf.mxu0  ;;  %v3813_v58 = vsel %vm3811_vm10, %v3802_v43, %v3804_v53  ;;  %v3814_v12 = vsel %vm3811_vm10, %v3804_v53, %v3806_v54 }
 0x189   : > { %4839 = vmatprep.subr.msk.bf16.mxu0 %vm216_vm1, %v3813_v58  ;;  %v3827_v20 = vsel %vm216_vm1, %v3814_v12, 0 }
 0x18a   : > { %v981_v59 = vpop.f32.mrf.mxu0  ;;  %v1061_v60 = vpop.f32.mrf.mxu1  ;;  %4834 = vmatmul.mubr.msk.bf16.vlgmr.msra.gmra.mxu1 %vm212_vm2, %v4832_v52 }
 0x18b   : > { %v1149_v61 = vadd.f32 %v1061_v60, %v984_v31  ;;  %5051 = vmatpush3.bf16.msra.mxu1 %v3668_v55  ;;  %v3808_v62 = vpop.permute.xlu0 %3807  ;;  %v3810_v63 = vpop.permute.xlu1 %3809  ;;  %5052 = vmatprep.mubr.msk.bf16.mxu1 %vm5154_vm3, %v5153_v21  ;;  %v4844_v55 = vld [vmem:[%s5992_s1 + $0x5c] sm:$0xf] }
 0x18c   : > { %v4953_v2 = vpop.f32.mrf.mxu0  ;;  %v1063_v7 = vpop.f32.mrf.mxu1  ;;  %v3815_v10 = vsel %vm3811_vm10, %v3806_v54, %v3808_v62  ;;  %v3816_v24 = vsel %vm3811_vm10, %v3808_v62, %v3810_v63 }
 0x18d   : > { %v1150_v13 = vadd.f32 %v1063_v7, %v985_v38  ;;  %4841 = vmatprep.subr.msk.bf16.mxu1 %vm216_vm1, %v3815_v10  ;;  %v3833_v28 = vsel %vm216_vm1, %v3816_v24, 0 }
 0x18e   : > { %v1065_v14 = vpop.f32.mrf.mxu1  ;;  %v1102_v15 = vpop.f32.mrf.mxu0  ;;  %4836 = vmatmul.mubr.msk.bf16.vlgmr.msra.gmra.mxu0 %vm212_vm2, %v4832_v52 }
 0x18f   : > { %v1151_v16 = vadd.f32 %v1102_v15, %v986_v41  ;;  %3850 = vmatpush1.bf16.msra.mxu0 %v3821_v1  ;;  %v3965_v17 = vpop.permute.xlu0 %3964  ;;  %v3967_v18 = vpop.permute.xlu1 %3966  ;;  %3867 = vmatprep.mubr.bf16.mxu0 %v5141_v0 }
 0x190   : > { %v1066_v22 = vpop.f32.mrf.mxu1  ;;  %v1104_v23 = vpop.f32.mrf.mxu0  ;;  %5056 = vmatprep.subr.bf16.mxu0 %v5153_v21  ;;  %v3977_v31 = vsel %vm3976_vm11, %v3965_v17, %v3967_v18 }
 0x191   : > { %v1152_v25 = vadd.f32 %v1104_v23, %v987_v48  ;;  %v3986_v36 = vsel %vm216_vm1, %v3977_v31, 0 }
 0x192   : > { %v1106_v5 = vpop.f32.mrf.mxu0  ;;  %v1143_v3 = vpop.f32.mrf.mxu1  ;;  %5053 = vmatmul.mubr.msk.bf16.vlgmr.msra.gmra.mxu1 %vm212_vm2, %v4832_v52 }
 0x193   : > { %v1153_v26 = vadd.f32 %v1143_v3, %v988_v51  ;;  %3891 = vmatpush1.bf16.msra.mxu1 %v3827_v20  ;;  %v3969_v6 = vpop.permute.xlu0 %3968  ;;  %v3971_v8 = vpop.permute.xlu1 %3970  ;;  %3908 = vmatprep.mubr.bf16.mxu1 %v5141_v0 }
 0x194   : > { %v1107_v29 = vpop.f32.mrf.mxu0  ;;  %v4958_v30 = vpop.f32.mrf.mxu1  ;;  %v3978_v9 = vsel %vm3976_vm11, %v3967_v18, %v3969_v6  ;;  %v3979_v40 = vsel %vm3976_vm11, %v3969_v6, %v3971_v8 }
 0x195   : > { %4845 = vmatprep.subr.msk.bf16.mxu1 %vm216_vm1, %v3978_v9  ;;  %v3992_v47 = vsel %vm216_vm1, %v3979_v40, 0 }
 0x196   : > { %v1146_v19 = vpop.f32.mrf.mxu1  ;;  %v1226_v32 = vpop.f32.mrf.mxu0  ;;  %4840 = vmatmul.mubr.msk.bf16.vlgmr.msra.gmra.mxu0 %vm212_vm2, %v4838_v27 }
 0x197   : > { %v1314_v33 = vadd.f32 %v1226_v32, %v1149_v61  ;;  %5057 = vmatpush3.bf16.msra.mxu0 %v3833_v28  ;;  %v3973_v34 = vpop.permute.xlu0 %3972  ;;  %v3975_v35 = vpop.permute.xlu1 %3974  ;;  %5058 = vmatprep.mubr.msk.bf16.mxu0 %vm5154_vm3, %v5153_v21 }
 0x198   : > { %v4959_v37 = vpop.f32.mrf.mxu1  ;;  %v1228_v38 = vpop.f32.mrf.mxu0  ;;  %v3980_v39 = vsel %vm3976_vm11, %v3971_v8, %v3973_v34  ;;  %v3981_v50 = vsel %vm3976_vm11, %v3973_v34, %v3975_v35  ;;  %v4850_v8 = vld [vmem:[%s5992_s1 + $0x60] sm:$0xf] }
 0x199   : > { %v1315_v41 = vadd.f32 %v1228_v38, %v1150_v13  ;;  %4847 = vmatprep.subr.msk.bf16.mxu0 %vm216_vm1, %v3980_v39  ;;  %v3998_v58 = vsel %vm216_vm1, %v3981_v50, 0 }
 0x19a   : > { %v1230_v42 = vpop.f32.mrf.mxu0  ;;  %v1267_v43 = vpop.f32.mrf.mxu1  ;;  %4842 = vmatmul.mubr.msk.bf16.vlgmr.msra.gmra.mxu1 %vm212_vm2, %v4838_v27 }
 0x19b   : > { %v1316_v44 = vadd.f32 %v1267_v43, %v1151_v16  ;;  %4015 = vmatpush1.bf16.msra.mxu1 %v3986_v36  ;;  %v4130_v45 = vpop.permute.xlu0 %4129  ;;  %v4132_v46 = vpop.permute.xlu1 %4131  ;;  %4032 = vmatprep.mubr.bf16.mxu1 %v5141_v0 }
 0x19c   : > { %v1231_v48 = vpop.f32.mrf.mxu0  ;;  %v1269_v49 = vpop.f32.mrf.mxu1  ;;  %5062 = vmatprep.subr.bf16.mxu1 %v5153_v21  ;;  %v4142_v61 = vsel %vm4141_vm12, %v4130_v45, %v4132_v46 }
 0x19d   : > { %v1317_v51 = vadd.f32 %v1269_v49, %v1152_v25  ;;  %v4151_v10 = vsel %vm216_vm1, %v4142_v61, 0 }
 0x19e   : > { %v1271_v52 = vpop.f32.mrf.mxu1  ;;  %v1308_v53 = vpop.f32.mrf.mxu0  ;;  %5059 = vmatmul.mubr.msk.bf16.vlgmr.msra.gmra.mxu0 %vm212_vm2, %v4838_v27 }
 0x19f   : > { %v1318_v54 = vadd.f32 %v1308_v53, %v1153_v26  ;;  %4056 = vmatpush1.bf16.msra.mxu0 %v3992_v47  ;;  %v4134_v56 = vpop.permute.xlu0 %4133  ;;  %v4136_v57 = vpop.permute.xlu1 %4135  ;;  %4073 = vmatprep.mubr.bf16.mxu0 %v5141_v0 }
 0x1a0   : > { %v1272_v4 = vpop.f32.mrf.mxu1  ;;  %v4964_v59 = vpop.f32.mrf.mxu0  ;;  %v4143_v60 = vsel %vm4141_vm12, %v4132_v46, %v4134_v56  ;;  %v4144_v14 = vsel %vm4141_vm12, %v4134_v56, %v4136_v57 }
 0x1a1   : > { %4851 = vmatprep.subr.msk.bf16.mxu0 %vm216_vm1, %v4143_v60  ;;  %v4157_v23 = vsel %vm216_vm1, %v4144_v14, 0 }
 0x1a2   : > { %v1311_v62 = vpop.f32.mrf.mxu0  ;;  %v1391_v63 = vpop.f32.mrf.mxu1  ;;  %4846 = vmatmul.mubr.msk.bf16.vlgmr.msra.gmra.mxu1 %vm212_vm2, %v4844_v55 }
 0x1a3   : > { %v1479_v1 = vadd.f32 %v1391_v63, %v1314_v33  ;;  %5063 = vmatpush3.bf16.msra.mxu1 %v3998_v58  ;;  %v4138_v2 = vpop.permute.xlu0 %4137  ;;  %v4140_v7 = vpop.permute.xlu1 %4139  ;;  %5064 = vmatprep.mubr.msk.bf16.mxu1 %vm5154_vm3, %v5153_v21 }
 0x1a4   : > { %v4965_v11 = vpop.f32.mrf.mxu0  ;;  %v1393_v12 = vpop.f32.mrf.mxu1  ;;  %v4145_v13 = vsel %vm4141_vm12, %v4136_v57, %v4138_v2  ;;  %v4146_v5 = vsel %vm4141_vm12, %v4138_v2, %v4140_v7  ;;  %v4856_v57 = vld [vmem:[%s5992_s1 + $0x64] sm:$0xf] }
 0x1a5   : > { %v1480_v15 = vadd.f32 %v1393_v12, %v1315_v41  ;;  %4853 = vmatprep.subr.msk.bf16.mxu1 %vm216_vm1, %v4145_v13  ;;  %v4163_v30 = vsel %vm216_vm1, %v4146_v5, 0 }
 0x1a6   : > { %v1395_v16 = vpop.f32.mrf.mxu1  ;;  %v1432_v17 = vpop.f32.mrf.mxu0  ;;  %4848 = vmatmul.mubr.msk.bf16.vlgmr.msra.gmra.mxu0 %vm212_vm2, %v4844_v55 }
 0x1a7   : > { %v1481_v18 = vadd.f32 %v1432_v17, %v1316_v44  ;;  %4180 = vmatpush1.bf16.msra.mxu0 %v4151_v10  ;;  %v4295_v20 = vpop.permute.xlu0 %4294  ;;  %v4297_v22 = vpop.permute.xlu1 %4296  ;;  %4197 = vmatprep.mubr.bf16.mxu0 %v5141_v0 }
 0x1a8   : > { %v1396_v24 = vpop.f32.mrf.mxu1  ;;  %v1434_v25 = vpop.f32.mrf.mxu0  ;;  %5068 = vmatprep.subr.bf16.mxu0 %v5153_v21  ;;  %v4307_v32 = vsel %vm4306_vm13, %v4295_v20, %v4297_v22 }
 0x1a9   : > { %v1482_v3 = vadd.f32 %v1434_v25, %v1317_v51  ;;  %v4316_v38 = vsel %vm216_vm1, %v4307_v32, 0 }
 0x1aa   : > { %v1436_v26 = vpop.f32.mrf.mxu0  ;;  %v1473_v27 = vpop.f32.mrf.mxu1  ;;  %5065 = vmatmul.mubr.msk.bf16.vlgmr.msra.gmra.mxu1 %vm212_vm2, %v4844_v55 }
 0x1ab   : > { %v1483_v6 = vadd.f32 %v1473_v27, %v1318_v54  ;;  %4221 = vmatpush1.bf16.msra.mxu1 %v4157_v23  ;;  %v4299_v28 = vpop.permute.xlu0 %4298  ;;  %v4301_v29 = vpop.permute.xlu1 %4300  ;;  %4238 = vmatprep.mubr.bf16.mxu1 %v5141_v0 }
 0x1ac   : > { %v1437_v9 = vpop.f32.mrf.mxu0  ;;  %v4970_v31 = vpop.f32.mrf.mxu1  ;;  %v4308_v19 = vsel %vm4306_vm13, %v4297_v22, %v4299_v28  ;;  %v4309_v42 = vsel %vm4306_vm13, %v4299_v28, %v4301_v29 }
 0x1ad   : > { %4857 = vmatprep.subr.msk.bf16.mxu1 %vm216_vm1, %v4308_v19  ;;  %v4322_v49 = vsel %vm216_vm1, %v4309_v42, 0 }
 0x1ae   : > { %v1476_v33 = vpop.f32.mrf.mxu1  ;;  %v1556_v34 = vpop.f32.mrf.mxu0  ;;  %4852 = vmatmul.mubr.msk.bf16.vlgmr.msra.gmra.mxu0 %vm212_vm2, %v4850_v8 }
 0x1af   : > { %v1644_v35 = vadd.f32 %v1556_v34, %v1479_v1  ;;  %5069 = vmatpush3.bf16.msra.mxu0 %v4163_v30  ;;  %v4303_v36 = vpop.permute.xlu0 %4302  ;;  %v4305_v37 = vpop.permute.xlu1 %4304  ;;  %5070 = vmatprep.mubr.msk.bf16.mxu0 %vm5154_vm3, %v5153_v21 }
 0x1b0   : > { %v4971_v39 = vpop.f32.mrf.mxu1  ;;  %v1558_v40 = vpop.f32.mrf.mxu0  ;;  %v4310_v41 = vsel %vm4306_vm13, %v4301_v29, %v4303_v36  ;;  %v4311_v52 = vsel %vm4306_vm13, %v4303_v36, %v4305_v37 }
 0x1b1   : > { %v1645_v43 = vadd.f32 %v1558_v40, %v1480_v15  ;;  %4859 = vmatprep.subr.msk.bf16.mxu0 %vm216_vm1, %v4310_v41  ;;  %v4328_v4 = vsel %vm216_vm1, %v4311_v52, 0 }
 0x1b2   : > { %v1560_v44 = vpop.f32.mrf.mxu0  ;;  %v1597_v45 = vpop.f32.mrf.mxu1  ;;  %4854 = vmatmul.mubr.msk.bf16.vlgmr.msra.gmra.mxu1 %vm212_vm2, %v4850_v8 }
 0x1b3   : > { %v1646_v46 = vadd.f32 %v1597_v45, %v1481_v18  ;;  %4345 = vmatpush1.bf16.msra.mxu1 %v4316_v38  ;;  %v4460_v47 = vpop.permute.xlu0 %4459  ;;  %v4462_v48 = vpop.permute.xlu1 %4461  ;;  %4362 = vmatprep.mubr.bf16.mxu1 %v5141_v0 }
 0x1b4   : > { %v1561_v50 = vpop.f32.mrf.mxu0  ;;  %v1599_v51 = vpop.f32.mrf.mxu1  ;;  %5074 = vmatprep.subr.bf16.mxu1 %v5153_v21  ;;  %v4472_v62 = vsel %vm4471_vm14, %v4460_v47, %v4462_v48 }
 0x1b5   : > { %v1647_v53 = vadd.f32 %v1599_v51, %v1482_v3  ;;  %v4481_v11 = vsel %vm216_vm1, %v4472_v62, 0 }
 0x1b6   : > { %v1601_v54 = vpop.f32.mrf.mxu1  ;;  %v1638_v55 = vpop.f32.mrf.mxu0  ;;  %5071 = vmatmul.mubr.msk.bf16.vlgmr.msra.gmra.mxu0 %vm212_vm2, %v4850_v8  ;;  %v4862_v8 = vld [vmem:[%s5992_s1 + $0x68] sm:$0xf] }
 0x1b7   : > { %v1648_v56 = vadd.f32 %v1638_v55, %v1483_v6  ;;  %4386 = vmatpush1.bf16.msra.mxu0 %v4322_v49  ;;  %v4464_v58 = vpop.permute.xlu0 %4463  ;;  %4403 = vmatprep.mubr.bf16.mxu0 %v5141_v0  ;;  %v4466_v63 = vpop.permute.xlu1 %4465 }
 0x1b8   : > { %v1602_v59 = vpop.f32.mrf.mxu1  ;;  %v4976_v60 = vpop.f32.mrf.mxu0  ;;  %v4473_v61 = vsel %vm4471_vm14, %v4462_v48, %v4464_v58  ;;  %v4474_v15 = vsel %vm4471_vm14, %v4464_v58, %v4466_v63 }
 0x1b9   : > { %4863 = vmatprep.subr.msk.bf16.mxu0 %vm216_vm1, %v4473_v61  ;;  %v4487_v23 = vsel %vm216_vm1, %v4474_v15, 0 }
 0x1ba   : > { %v1641_v1 = vpop.f32.mrf.mxu0  ;;  %v1721_v2 = vpop.f32.mrf.mxu1  ;;  %4858 = vmatmul.mubr.msk.bf16.vlgmr.msra.gmra.mxu1 %vm212_vm2, %v4856_v57 }
 0x1bb   : > { %v1809_v7 = vadd.f32 %v1721_v2, %v1644_v35  ;;  %5075 = vmatpush3.bf16.msra.mxu1 %v4328_v4  ;;  %v4468_v10 = vpop.permute.xlu0 %4467  ;;  %5076 = vmatprep.mubr.msk.bf16.mxu1 %vm5154_vm3, %v5153_v21  ;;  %v4470_v17 = vpop.permute.xlu1 %4469 }
 0x1bc   : > { %v4977_v12 = vpop.f32.mrf.mxu0  ;;  %v1723_v13 = vpop.f32.mrf.mxu1  ;;  %v4475_v14 = vsel %vm4471_vm14, %v4466_v63, %v4468_v10  ;;  %v4476_v3 = vsel %vm4471_vm14, %v4468_v10, %v4470_v17 }
 0x1bd   : > { %v1810_v16 = vadd.f32 %v1723_v13, %v1645_v43  ;;  %4865 = vmatprep.subr.msk.bf16.mxu1 %vm216_vm1, %v4475_v14  ;;  %v4493_v28 = vsel %vm216_vm1, %v4476_v3, 0 }
 0x1be   : > { %v1725_v18 = vpop.f32.mrf.mxu1  ;;  %v1762_v20 = vpop.f32.mrf.mxu0  ;;  %4860 = vmatmul.mubr.msk.bf16.vlgmr.msra.gmra.mxu0 %vm212_vm2, %v4856_v57 }
 0x1bf   : > { %v1811_v22 = vadd.f32 %v1762_v20, %v1646_v46  ;;  %4510 = vmatpush1.bf16.msra.mxu0 %v4481_v11  ;;  %4527 = vmatprep.mubr.bf16.mxu0 %v5141_v0 }
 0x1c0   : > { %v1726_v24 = vpop.f32.mrf.mxu1  ;;  %v1764_v25 = vpop.f32.mrf.mxu0  ;;  %5080 = vmatprep.subr.bf16.mxu0 %v5153_v21 }
 0x1c1   : > { %v1812_v5 = vadd.f32 %v1764_v25, %v1647_v53 }
 0x1c2   : > { %v1766_v26 = vpop.f32.mrf.mxu0  ;;  %v1803_v27 = vpop.f32.mrf.mxu1  ;;  %5077 = vmatmul.mubr.msk.bf16.vlgmr.msra.gmra.mxu1 %vm212_vm2, %v4856_v57 }
 0x1c3   : > { %v1813_v6 = vadd.f32 %v1803_v27, %v1648_v56  ;;  %4551 = vmatpush1.bf16.msra.mxu1 %v4487_v23  ;;  %4568 = vmatprep.mubr.bf16.mxu1 %v5141_v0 }
 0x1c4   : > { %v1767_v29 = vpop.f32.mrf.mxu0  ;;  %v4982_v30 = vpop.f32.mrf.mxu1 }
 0x1c6   : > { %v1806_v9 = vpop.f32.mrf.mxu1  ;;  %v1886_v31 = vpop.f32.mrf.mxu0  ;;  %4864 = vmatmul.mubr.msk.bf16.vlgmr.msra.gmra.mxu0 %vm212_vm2, %v4862_v8 }
 0x1c7   : > { %v1974_v19 = vadd.f32 %v1886_v31, %v1809_v7  ;;  %5081 = vmatpush3.bf16.msra.mxu0 %v4493_v28  ;;  %5082 = vmatprep.mubr.msk.bf16.mxu0 %vm5154_vm3, %v5153_v21 }
 0x1c8   : > { %v4983_v32 = vpop.f32.mrf.mxu1  ;;  %v1888_v33 = vpop.f32.mrf.mxu0 }
 0x1c9   : > { %v1975_v34 = vadd.f32 %v1888_v33, %v1810_v16 }
 0x1ca   : > { %v1890_v35 = vpop.f32.mrf.mxu0  ;;  %v1927_v36 = vpop.f32.mrf.mxu1  ;;  %4866 = vmatmul.mubr.msk.bf16.vlgmr.msra.gmra.mxu1 %vm212_vm2, %v4862_v8 }
 0x1cb   : > { %v1976_v0 = vadd.f32 %v1927_v36, %v1811_v22 }
 0x1cc   : > { %v1891_v37 = vpop.f32.mrf.mxu0  ;;  %v1929_v38 = vpop.f32.mrf.mxu1 }
 0x1cd   : > { %v1977_v39 = vadd.f32 %v1929_v38, %v1812_v5 }
 0x1ce   : > { %v1931_v40 = vpop.f32.mrf.mxu1  ;;  %v1968_v41 = vpop.f32.mrf.mxu0  ;;  %5083 = vmatmul.mubr.msk.bf16.vlgmr.msra.gmra.mxu0 %vm212_vm2, %v4862_v8 }
 0x1cf   : > { %v1978_v42 = vadd.f32 %v1968_v41, %v1813_v6 }
 0x1d0   : > { %v1932_v43 = vpop.f32.mrf.mxu1  ;;  %v4988_v44 = vpop.f32.mrf.mxu0 }
 0x1d2   : > { %v1971_v45 = vpop.f32.mrf.mxu0  ;;  %v2051_v21 = vpop.f32.mrf.mxu1 }
 0x1d3   : > { %v2139_v46 = vadd.f32 %v2051_v21, %v1974_v19 }
 0x1d4   : > { %v4989_v47 = vpop.f32.mrf.mxu0  ;;  %v2053_v48 = vpop.f32.mrf.mxu1 }
 0x1d5   : > { %v2140_v49 = vadd.f32 %v2053_v48, %v1975_v34 }
 0x1d6   : > { %v2055_v50 = vpop.f32.mrf.mxu1  ;;  %v2092_v51 = vpop.f32.mrf.mxu0 }
 0x1d7   : > { %v2141_v52 = vadd.f32 %v2092_v51, %v1976_v0 }
 0x1d8   : > { %v2056_v53 = vpop.f32.mrf.mxu1  ;;  %v2094_v54 = vpop.f32.mrf.mxu0 }
 0x1d9   : > { %v2142_v55 = vadd.f32 %v2094_v54, %v1977_v39 }
 0x1da   : > { %v2096_v56 = vpop.f32.mrf.mxu0  ;;  %v2133_v57 = vpop.f32.mrf.mxu1 }
 0x1db   : > { %v2143_v58 = vadd.f32 %v2133_v57, %v1978_v42 }
 0x1dc   : > { %v2097_v4 = vpop.f32.mrf.mxu0  ;;  %v4994_v59 = vpop.f32.mrf.mxu1 }
 0x1de   : > { %v2136_v60 = vpop.f32.mrf.mxu1  ;;  %v2216_v61 = vpop.f32.mrf.mxu0 }
 0x1df   : > { %v2304_v62 = vadd.f32 %v2216_v61, %v2139_v46 }
 0x1e0   : > { %v4995_v63 = vpop.f32.mrf.mxu1  ;;  %v2218_v1 = vpop.f32.mrf.mxu0 }
 0x1e1   : > { %v2305_v2 = vadd.f32 %v2218_v1, %v2140_v49 }
 0x1e2   : > { %v2220_v7 = vpop.f32.mrf.mxu0  ;;  %v2257_v10 = vpop.f32.mrf.mxu1 }
 0x1e3   : > { %v2306_v11 = vadd.f32 %v2257_v10, %v2141_v52 }
 0x1e4   : > { %v2221_v12 = vpop.f32.mrf.mxu0  ;;  %v2259_v13 = vpop.f32.mrf.mxu1 }
 0x1e5   : > { %v2307_v14 = vadd.f32 %v2259_v13, %v2142_v55 }
 0x1e6   : > { %v2261_v15 = vpop.f32.mrf.mxu1  ;;  %v2298_v16 = vpop.f32.mrf.mxu0 }
 0x1e7   : > { %v2308_v17 = vadd.f32 %v2298_v16, %v2143_v58 }
 0x1e8   : > { %v2262_v18 = vpop.f32.mrf.mxu1  ;;  %v5000_v20 = vpop.f32.mrf.mxu0 }
 0x1ea   : > { %v2301_v22 = vpop.f32.mrf.mxu0  ;;  %v2381_v23 = vpop.f32.mrf.mxu1 }
 0x1eb   : > { %v2469_v24 = vadd.f32 %v2381_v23, %v2304_v62 }
 0x1ec   : > { %v5001_v25 = vpop.f32.mrf.mxu0  ;;  %v2383_v5 = vpop.f32.mrf.mxu1 }
 0x1ed   : > { %v2470_v3 = vadd.f32 %v2383_v5, %v2305_v2 }
 0x1ee   : > { %v2385_v26 = vpop.f32.mrf.mxu1  ;;  %v2422_v27 = vpop.f32.mrf.mxu0 }
 0x1ef   : > { %v2471_v6 = vadd.f32 %v2422_v27, %v2306_v11 }
 0x1f0   : > { %v2386_v8 = vpop.f32.mrf.mxu1  ;;  %v2424_v28 = vpop.f32.mrf.mxu0 }
 0x1f1   : > { %v2472_v29 = vadd.f32 %v2424_v28, %v2307_v14 }
 0x1f2   : > { %v2426_v30 = vpop.f32.mrf.mxu0  ;;  %v2463_v9 = vpop.f32.mrf.mxu1 }
 0x1f3   : > { %v2473_v31 = vadd.f32 %v2463_v9, %v2308_v17 }
 0x1f4   : > { %v2427_v19 = vpop.f32.mrf.mxu0  ;;  %v5006_v32 = vpop.f32.mrf.mxu1 }
 0x1f6   : > { %v2466_v33 = vpop.f32.mrf.mxu1  ;;  %v2546_v34 = vpop.f32.mrf.mxu0 }
 0x1f7   : > { %v2634_v35 = vadd.f32 %v2546_v34, %v2469_v24 }
 0x1f8   : > { %v5007_v36 = vpop.f32.mrf.mxu1  ;;  %v2548_v0 = vpop.f32.mrf.mxu0 }
 0x1f9   : > { %v2635_v37 = vadd.f32 %v2548_v0, %v2470_v3 }
 0x1fa   : > { %v2550_v38 = vpop.f32.mrf.mxu0  ;;  %v2587_v39 = vpop.f32.mrf.mxu1 }
 0x1fb   : > { %v2636_v40 = vadd.f32 %v2587_v39, %v2471_v6 }
 0x1fc   : > { %v2551_v41 = vpop.f32.mrf.mxu0  ;;  %v2589_v42 = vpop.f32.mrf.mxu1 }
 0x1fd   : > { %v2637_v43 = vadd.f32 %v2589_v42, %v2472_v29 }
 0x1fe   : > { %v2591_v44 = vpop.f32.mrf.mxu1  ;;  %v2628_v45 = vpop.f32.mrf.mxu0 }
 0x1ff   : > { %v2638_v21 = vadd.f32 %v2628_v45, %v2473_v31 }
 0x200   : > { %v2592_v46 = vpop.f32.mrf.mxu1  ;;  %v5012_v47 = vpop.f32.mrf.mxu0 }
 0x202   : > { %v2631_v48 = vpop.f32.mrf.mxu0  ;;  %v2711_v49 = vpop.f32.mrf.mxu1 }
 0x203   : > { %v2799_v50 = vadd.f32 %v2711_v49, %v2634_v35 }
 0x204   : > { %v5013_v51 = vpop.f32.mrf.mxu0  ;;  %v2713_v52 = vpop.f32.mrf.mxu1 }
 0x205   : > { %v2800_v53 = vadd.f32 %v2713_v52, %v2635_v37 }
 0x206   : > { %v2715_v54 = vpop.f32.mrf.mxu1  ;;  %v2752_v55 = vpop.f32.mrf.mxu0 }
 0x207   : > { %v2801_v56 = vadd.f32 %v2752_v55, %v2636_v40 }
 0x208   : > { %v2716_v57 = vpop.f32.mrf.mxu1  ;;  %v2754_v58 = vpop.f32.mrf.mxu0 }
 0x209   : > { %v2802_v4 = vadd.f32 %v2754_v58, %v2637_v43 }
 0x20a   : > { %v2756_v59 = vpop.f32.mrf.mxu0  ;;  %v2793_v60 = vpop.f32.mrf.mxu1 }
 0x20b   : > { %v2803_v61 = vadd.f32 %v2793_v60, %v2638_v21 }
 0x20c   : > { %v2757_v62 = vpop.f32.mrf.mxu0  ;;  %v5018_v63 = vpop.f32.mrf.mxu1 }
 0x20e   : > { %v2796_v1 = vpop.f32.mrf.mxu1  ;;  %v2876_v2 = vpop.f32.mrf.mxu0 }
 0x20f   : > { %v2964_v7 = vadd.f32 %v2876_v2, %v2799_v50 }
 0x210   : > { %v5019_v10 = vpop.f32.mrf.mxu1  ;;  %v2878_v11 = vpop.f32.mrf.mxu0 }
 0x211   : > { %v2965_v12 = vadd.f32 %v2878_v11, %v2800_v53 }
 0x212   : > { %v2880_v13 = vpop.f32.mrf.mxu0  ;;  %v2917_v14 = vpop.f32.mrf.mxu1 }
 0x213   : > { %v2966_v15 = vadd.f32 %v2917_v14, %v2801_v56 }
 0x214   : > { %v2881_v16 = vpop.f32.mrf.mxu0  ;;  %v2919_v17 = vpop.f32.mrf.mxu1 }
 0x215   : > { %v2967_v18 = vadd.f32 %v2919_v17, %v2802_v4 }
 0x216   : > { %v2921_v20 = vpop.f32.mrf.mxu1  ;;  %v2958_v22 = vpop.f32.mrf.mxu0 }
 0x217   : > { %v2968_v23 = vadd.f32 %v2958_v22, %v2803_v61 }
 0x218   : > { %v2922_v24 = vpop.f32.mrf.mxu1  ;;  %v5024_v25 = vpop.f32.mrf.mxu0 }
 0x21a   : > { %v2961_v5 = vpop.f32.mrf.mxu0  ;;  %v3041_v3 = vpop.f32.mrf.mxu1 }
 0x21b   : > { %v3129_v26 = vadd.f32 %v3041_v3, %v2964_v7 }
 0x21c   : > { %v5025_v27 = vpop.f32.mrf.mxu0  ;;  %v3043_v6 = vpop.f32.mrf.mxu1 }
 0x21d   : > { %v3130_v8 = vadd.f32 %v3043_v6, %v2965_v12 }
 0x21e   : > { %v3045_v28 = vpop.f32.mrf.mxu1  ;;  %v3082_v29 = vpop.f32.mrf.mxu0 }
 0x21f   : > { %v3131_v30 = vadd.f32 %v3082_v29, %v2966_v15 }
 0x220   : > { %v3046_v9 = vpop.f32.mrf.mxu1  ;;  %v3084_v31 = vpop.f32.mrf.mxu0 }
 0x221   : > { %v3132_v19 = vadd.f32 %v3084_v31, %v2967_v18 }
 0x222   : > { %v3086_v32 = vpop.f32.mrf.mxu0  ;;  %v3123_v33 = vpop.f32.mrf.mxu1 }
 0x223   : > { %v3133_v34 = vadd.f32 %v3123_v33, %v2968_v23 }
 0x224   : > { %v3087_v35 = vpop.f32.mrf.mxu0  ;;  %v5030_v36 = vpop.f32.mrf.mxu1 }
 0x226   : > { %v3126_v0 = vpop.f32.mrf.mxu1  ;;  %v3209_v37 = vpop.f32.mrf.mxu0 }
 0x227   : > { %v3297_v38 = vadd.f32 %v3209_v37, %v3129_v26 }
 0x228   : > { %v5031_v39 = vpop.f32.mrf.mxu1  ;;  %v3211_v40 = vpop.f32.mrf.mxu0 }
 0x229   : > { %v3298_v41 = vadd.f32 %v3211_v40, %v3130_v8 }
 0x22a   : > { %v3213_v42 = vpop.f32.mrf.mxu0  ;;  %v3250_v43 = vpop.f32.mrf.mxu1 }
 0x22b   : > { %v3299_v44 = vadd.f32 %v3250_v43, %v3131_v30 }
 0x22c   : > { %v3214_v45 = vpop.f32.mrf.mxu0  ;;  %v3252_v21 = vpop.f32.mrf.mxu1 }
 0x22d   : > { %v3300_v46 = vadd.f32 %v3252_v21, %v3132_v19 }
 0x22e   : > { %v3254_v47 = vpop.f32.mrf.mxu1  ;;  %v3291_v48 = vpop.f32.mrf.mxu0 }
 0x22f   : > { %v3301_v49 = vadd.f32 %v3291_v48, %v3133_v34 }
 0x230   : > { %v3255_v50 = vpop.f32.mrf.mxu1  ;;  %v5036_v51 = vpop.f32.mrf.mxu0 }
 0x232   : > { %v3294_v52 = vpop.f32.mrf.mxu0  ;;  %v3374_v53 = vpop.f32.mrf.mxu1 }
 0x233   : > { %v5957_v54 = vadd.f32 %v3374_v53, %v3297_v38 }
 0x234   : > { %v5037_v55 = vpop.f32.mrf.mxu0  ;;  %v3376_v56 = vpop.f32.mrf.mxu1 }
 0x235   : > { %v5959_v57 = vadd.f32 %v3376_v56, %v3298_v41 }
 0x236   : > { %v3378_v58 = vpop.f32.mrf.mxu1  ;;  %v3415_v4 = vpop.f32.mrf.mxu0 }
 0x237   : > { %v5961_v59 = vadd.f32 %v3415_v4, %v3299_v44 }
 0x238   : > { %v3379_v60 = vpop.f32.mrf.mxu1  ;;  %v3417_v61 = vpop.f32.mrf.mxu0 }
 0x239   : > { %v5963_v62 = vadd.f32 %v3417_v61, %v3300_v46 }
 0x23a   : > { %v3419_v63 = vpop.f32.mrf.mxu0  ;;  %v3456_v1 = vpop.f32.mrf.mxu1 }
 0x23b   : > { %v5965_v2 = vadd.f32 %v3456_v1, %v3301_v49 }
 0x23c   : > { %v3420_v7 = vpop.f32.mrf.mxu0  ;;  %v5042_v10 = vpop.f32.mrf.mxu1 }
 0x23e   : > { %v3459_v11 = vpop.f32.mrf.mxu1  ;;  %v3539_v12 = vpop.f32.mrf.mxu0 }
 0x240   : > { %v5043_v13 = vpop.f32.mrf.mxu1  ;;  %v3541_v14 = vpop.f32.mrf.mxu0 }
 0x242   : > { %v3543_v15 = vpop.f32.mrf.mxu0  ;;  %v5967_v16 = vpop.f32.mrf.mxu1 }
 0x244   : > { %v3544_v17 = vpop.f32.mrf.mxu0  ;;  %v5969_v18 = vpop.f32.mrf.mxu1 }
 0x245   : > { %v3627_v17 = vadd.f32 %v3539_v12, %v5957_v54 }
 0x246   : > { %v3584_v20 = vpop.f32.mrf.mxu1  ;;  %v5971_v22 = vpop.f32.mrf.mxu0 }
 0x248   : > { %v3585_v23 = vpop.f32.mrf.mxu1  ;;  %v5048_v24 = vpop.f32.mrf.mxu0 }
 0x249   : > { %v3628_v24 = vadd.f32 %v3541_v14, %v5959_v57  ;;  %v3631_v57 = vadd.f32 %v5971_v22, %v5965_v2 }
 0x24a   : > { %v3624_v25 = vpop.f32.mrf.mxu0  ;;  %v3704_v5 = vpop.f32.mrf.mxu1 }
 0x24b   : > { %v3792_v25 = vadd.f32 %v3704_v5, %v3627_v17 }
 0x24c   : > { %v5049_v3 = vpop.f32.mrf.mxu0  ;;  %v3706_v26 = vpop.f32.mrf.mxu1 }
 0x24e   : > { %v3708_v27 = vpop.f32.mrf.mxu1  ;;  %v3745_v6 = vpop.f32.mrf.mxu0 }
 0x250   : > { %v3709_v8 = vpop.f32.mrf.mxu1  ;;  %v3747_v28 = vpop.f32.mrf.mxu0 }
 0x251   : > { %v3629_v8 = vadd.f32 %v5967_v16, %v5961_v59 }
 0x252   : > { %v3749_v29 = vpop.f32.mrf.mxu0  ;;  %v5973_v30 = vpop.f32.mrf.mxu1 }
 0x253   : > { %v3793_v29 = vadd.f32 %v3706_v26, %v3628_v24  ;;  %v3796_v16 = vadd.f32 %v5973_v30, %v3631_v57 }
 0x254   : > { %v3750_v9 = vpop.f32.mrf.mxu0  ;;  %v5054_v31 = vpop.f32.mrf.mxu1 }
 0x256   : > { %v3789_v19 = vpop.f32.mrf.mxu1  ;;  %v3869_v32 = vpop.f32.mrf.mxu0 }
 0x257   : > { %v3957_v9 = vadd.f32 %v3869_v32, %v3792_v25 }
 0x258   : > { %v5055_v33 = vpop.f32.mrf.mxu1  ;;  %v3871_v34 = vpop.f32.mrf.mxu0 }
 0x259   : > { %v3630_v33 = vadd.f32 %v5969_v18, %v5963_v62  ;;  %v3958_v54 = vadd.f32 %v3871_v34, %v3793_v29 }
 0x25a   : > { %v3873_v35 = vpop.f32.mrf.mxu0  ;;  %v3910_v36 = vpop.f32.mrf.mxu1 }
 0x25b   : > { %v3794_v35 = vadd.f32 %v3745_v6, %v3629_v8  ;;  %v4626_v6 = vpop.permute.xlu0 %4625 }
 0x25c   : > { %v3874_v0 = vpop.f32.mrf.mxu0  ;;  %v3912_v37 = vpop.f32.mrf.mxu1 }
 0x25d   : > { %v3795_v0 = vadd.f32 %v3747_v28, %v3630_v33 }
 0x25e   : > { %v3914_v38 = vpop.f32.mrf.mxu1  ;;  %v3951_v39 = vpop.f32.mrf.mxu0 }
 0x25f   : > { %v3959_v38 = vadd.f32 %v3910_v36, %v3794_v35  ;;  %v3961_v34 = vadd.f32 %v3951_v39, %v3796_v16 }
 0x260   : > { %v3915_v40 = vpop.f32.mrf.mxu1  ;;  %v5060_v41 = vpop.f32.mrf.mxu0 }
 0x261   : > { %v3960_v41 = vadd.f32 %v3912_v37, %v3795_v0 }
 0x262   : > { %v3954_v42 = vpop.f32.mrf.mxu0  ;;  %v4034_v43 = vpop.f32.mrf.mxu1 }
 0x263   : > { %v4122_v12 = vadd.f32 %v4034_v43, %v3957_v9 }
 0x264   : > { %v5061_v44 = vpop.f32.mrf.mxu0  ;;  %v4036_v45 = vpop.f32.mrf.mxu1 }
 0x265   : > { %v4123_v40 = vadd.f32 %v4036_v45, %v3958_v54 }
 0x266   : > { %v4038_v21 = vpop.f32.mrf.mxu1  ;;  %v4075_v46 = vpop.f32.mrf.mxu0 }
 0x267   : > { %v4124_v42 = vadd.f32 %v4075_v46, %v3959_v38 }
 0x268   : > { %v4039_v47 = vpop.f32.mrf.mxu1  ;;  %v4077_v48 = vpop.f32.mrf.mxu0 }
 0x269   : > { %v4125_v2 = vadd.f32 %v4077_v48, %v3960_v41 }
 0x26a   : > { %v4079_v49 = vpop.f32.mrf.mxu0  ;;  %v4116_v50 = vpop.f32.mrf.mxu1 }
 0x26b   : > { %v4126_v36 = vadd.f32 %v4116_v50, %v3961_v34 }
 0x26c   : > { %v4080_v51 = vpop.f32.mrf.mxu0  ;;  %v5066_v52 = vpop.f32.mrf.mxu1 }
 0x26e   : > { %v4119_v53 = vpop.f32.mrf.mxu1  ;;  %v4199_v55 = vpop.f32.mrf.mxu0 }
 0x26f   : > { %v4287_v59 = vadd.f32 %v4199_v55, %v4122_v12 }
 0x270   : > { %v5067_v56 = vpop.f32.mrf.mxu1  ;;  %v4201_v58 = vpop.f32.mrf.mxu0 }
 0x271   : > { %v4288_v62 = vadd.f32 %v4201_v58, %v4123_v40 }
 0x272   : > { %v4203_v4 = vpop.f32.mrf.mxu0  ;;  %v4240_v60 = vpop.f32.mrf.mxu1 }
 0x273   : > { %v4289_v22 = vadd.f32 %v4240_v60, %v4124_v42 }
 0x274   : > { %v4204_v61 = vpop.f32.mrf.mxu0  ;;  %v4242_v63 = vpop.f32.mrf.mxu1 }
 0x275   : > { %v4290_v47 = vadd.f32 %v4242_v63, %v4125_v2 }
 0x276   : > { %v4244_v1 = vpop.f32.mrf.mxu1  ;;  %v4281_v7 = vpop.f32.mrf.mxu0 }
 0x277   : > { %v4291_v39 = vadd.f32 %v4281_v7, %v4126_v36 }
 0x278   : > { %v4245_v10 = vpop.f32.mrf.mxu1  ;;  %v5072_v11 = vpop.f32.mrf.mxu0 }
 0x27a   : > { %v4284_v13 = vpop.f32.mrf.mxu0  ;;  %v4364_v15 = vpop.f32.mrf.mxu1 }
 0x27b   : > { %v4452_v18 = vadd.f32 %v4364_v15, %v4287_v59 }
 0x27c   : > { %v5073_v20 = vpop.f32.mrf.mxu0  ;;  %v4366_v23 = vpop.f32.mrf.mxu1 }
 0x27d   : > { %v4453_v21 = vadd.f32 %v4366_v23, %v4288_v62 }
 0x27e   : > { %v4368_v3 = vpop.f32.mrf.mxu1  ;;  %v4405_v27 = vpop.f32.mrf.mxu0 }
 0x27f   : > { %v4454_v37 = vadd.f32 %v4405_v27, %v4289_v22 }
 0x280   : > { %v4369_v31 = vpop.f32.mrf.mxu1  ;;  %v4407_v19 = vpop.f32.mrf.mxu0 }
 0x281   : > { %v4455_v53 = vadd.f32 %v4407_v19, %v4290_v47 }
 0x282   : > { %v4409_v14 = vpop.f32.mrf.mxu0  ;;  %v4446_v5 = vpop.f32.mrf.mxu1 }
 0x283   : > { %v4456_v50 = vadd.f32 %v4446_v5, %v4291_v39 }
 0x284   : > { %v4410_v26 = vpop.f32.mrf.mxu0  ;;  %v5078_v32 = vpop.f32.mrf.mxu1 }
 0x286   : > { %v4449_v43 = vpop.f32.mrf.mxu1  ;;  %v4529_v44 = vpop.f32.mrf.mxu0 }
 0x287   : > { %v4617_v28 = vadd.f32 %v4529_v44, %v4452_v18 }
 0x288   : > { %v4531_v45 = vpop.f32.mrf.mxu0  ;;  %v5079_v30 = vpop.f32.mrf.mxu1 }
 0x289   : > { %v4618_v46 = vadd.f32 %v4531_v45, %v4453_v21  ;;  %v4628_v49 = vadd.f32 %v4626_v6, %v4617_v28 }
 0x28a   : > { %v4533_v51 = vpop.f32.mrf.mxu0  ;;  %v4570_v52 = vpop.f32.mrf.mxu1 }
 0x28b   : > { %v4629_v55 = vadd.f32 %v4626_v6, %v4618_v46  ;;  %4633 = vst [vmem:[%s170_s28] sm:$0xff] %v4628_v49  ;;  %v4619_v48 = vadd.f32 %v4570_v52, %v4454_v37 }
 0x28c   : > { %v4534_v56 = vpop.f32.mrf.mxu0  ;;  %v4572_v58 = vpop.f32.mrf.mxu1 }
 0x28d   : > { %4634 = vst [vmem:[%s170_s28 + $0x8] sm:$0xff] %v4629_v55  ;;  %v4630_v4 = vadd.f32 %v4626_v6, %v4619_v48  ;;  %v4620_v60 = vadd.f32 %v4572_v58, %v4455_v53 }
 0x28e   : > { %v4574_v61 = vpop.f32.mrf.mxu1  ;;  %v4611_v1 = vpop.f32.mrf.mxu0 }
 0x28f   : > { %4635 = vst [vmem:[%s170_s28 + $0x10] sm:$0xff] %v4630_v4  ;;  %v4631_v63 = vadd.f32 %v4626_v6, %v4620_v60  ;;  %v4621_v10 = vadd.f32 %v4611_v1, %v4456_v50 }
 0x290   : > { %v4575_v11 = vpop.f32.mrf.mxu1  ;;  %v5084_v13 = vpop.f32.mrf.mxu0 }
 0x291   : > { %4636 = vst [vmem:[%s170_s28 + $0x18] sm:$0xff] %v4631_v63  ;;  %v4632_v15 = vadd.f32 %v4626_v6, %v4621_v10 }
 0x292   : > { %v4614_v7 = vpop.f32.mrf.mxu0 }
 0x293   : > { %4637 = vst [vmem:[%s170_s28 + $0x20] sm:$0xff] %v4632_v15 }
 0x294   : > { %v5085_v17 = vpop.f32.mrf.mxu0 }
 0x295 PF: > { %s13_s12 = sadd.s32 1, %s5139_s12  }
 0x296   : > { %p10_p4 = scmp.ge.s32.totalorder %s13_s12, 4  }
 0x298   :  { %12 = sbr.rel (!%p10_p4) target bundleno = 1 (0x1), region = 88 }

</bundles_post_ra>
